<compile_context>
chip_gen: v6e
topology: v6e:2x2x1
jax: 0.10.0
libtpu: 0.0.40
codegen_flags: <defaults>
</compile_context>

<pallas_src>
import jax
import jax.numpy as jnp
from jax import lax
from jax.experimental import pallas as pl
from jax.experimental.pallas import tpu as pltpu

# --- small synthetic-BERT config (hidden_size shrunk from 768 -> 32) ---------
VOCAB = 64
NUM_TYPES = 2
SEQ = 8
HIDDEN = 32
NUM_HEADS = 4
HEAD_DIM = HIDDEN // NUM_HEADS
FFN = 64
NUM_CLASSES = 7
LOGIT_PAD = 128            # lane-dense classifier output; sliced to NUM_CLASSES outside
LN_EPS = 1e-12

# bf16 weight-slab column offsets (weights stored (in, out); in-dim on sublanes)
C_QKV, C_W1, C_WO, C_W2, C_WP, C_WC, C_E = 0, 96, 160, 192, 224, 256, 384
SLAB_COLS = 416
SLAB_ROWS = 64             # max in-dim (FFN=64); 32-in weights live in rows [0:32)

# f32 param-slab rows (one bias / LN vector per row, padded to 128 lanes)
(R_EMB_G, R_EMB_B, R_BQKV, R_BO, R_LN1G, R_LN1B,
 R_B1, R_B2, R_LN2G, R_LN2B, R_BP, R_BC) = range(12)
P_ROWS = 16


# ----------------------------- kernel helpers --------------------------------
def _mm(x, w):
    # x: (M, K) f32, w: (K, N) bf16 (pre-transposed) -> MXU with f32 accumulation.
    return jnp.dot(x.astype(jnp.bfloat16), w, preferred_element_type=jnp.float32)


def _ln(x, g, b):
    mu = jnp.mean(x, axis=-1, keepdims=True)
    var = jnp.mean((x - mu) ** 2, axis=-1, keepdims=True)
    return (x - mu) * lax.rsqrt(var + LN_EPS) * g + b


# --------------------------- fused forward kernel ----------------------------
def bert_fused_kernel(emb_ref, neg_ref, w_ref, p_ref, logits_ref):
    B, S = neg_ref.shape
    H = HIDDEN

    # ---- static slices of the packed slabs (free views, no relayout of weights) ----
    wqkv = w_ref[0:H, C_QKV:C_QKV + 3 * H]          # (32, 96)  bf16
    w1   = w_ref[0:H, C_W1:C_W1 + FFN]              # (32, 64)
    wo   = w_ref[0:H, C_WO:C_WO + H]                # (32, 32)
    w2   = w_ref[0:FFN, C_W2:C_W2 + H]              # (64, 32)
    wp   = w_ref[0:H, C_WP:C_WP + H]                # (32, 32)
    wc   = w_ref[0:H, C_WC:C_WC + LOGIT_PAD]        # (32, 128)
    hsum = w_ref[0:H, C_E:C_E + H]                  # (32, 32) block-diag head indicator

    emb_g = p_ref[R_EMB_G:R_EMB_G + 1, :H]
    emb_b = p_ref[R_EMB_B:R_EMB_B + 1, :H]
    bqkv  = p_ref[R_BQKV:R_BQKV + 1, :3 * H]
    bo    = p_ref[R_BO:R_BO + 1, :H]
    ln1_g = p_ref[R_LN1G:R_LN1G + 1, :H]
    ln1_b = p_ref[R_LN1B:R_LN1B + 1, :H]
    b1    = p_ref[R_B1:R_B1 + 1, :FFN]
    b2    = p_ref[R_B2:R_B2 + 1, :H]
    ln2_g = p_ref[R_LN2G:R_LN2G + 1, :H]
    ln2_b = p_ref[R_LN2B:R_LN2B + 1, :H]
    bp    = p_ref[R_BP:R_BP + 1, :H]
    bc    = p_ref[R_BC:R_BC + 1, :LOGIT_PAD]

    # ---- embedding LayerNorm ----
    x = _ln(emb_ref[...], emb_g, emb_b)                                   # (BS, H) f32

    # ---- fused QKV projection: one MXU push for Q, K and V ----
    qkv = _mm(x, wqkv) + bqkv                                             # (BS, 3H) f32
    scale = 1.0 / (HEAD_DIM ** 0.5)
    q = (qkv[:, 0 * H:1 * H] * scale).reshape(B, S, H)
    k = qkv[:, 1 * H:2 * H].reshape(B, S, H)
    v = qkv[:, 2 * H:3 * H].reshape(B, S, H)

    # ---- multi-head attention, all heads at once, lane-dense ----
    # prod[b,i,j,c] = q[b,i,c]*k[b,j,c];  one matmul with the block-diagonal head
    # indicator sums within each head: s[b,i,j,c] = score of head(c), replicated
    # across that head's 8 lanes.  Softmax/context are sublane reduces (no slicing).
    prod = q[:, :, None, :] * k[:, None, :, :]                            # (B,S,S,H) f32
    s = jnp.dot(prod.reshape(B * S * S, H).astype(jnp.bfloat16), hsum,
                preferred_element_type=jnp.float32).reshape(B, S, S, H)
    s = s + neg_ref[...][:, None, :, None]                                # mask keys j
    m = jnp.max(s, axis=2, keepdims=True)
    p = jnp.exp(s - m)
    p = p * pl.reciprocal(jnp.sum(p, axis=2, keepdims=True), approx=True)
    ctx = jnp.sum(p * v[:, None, :, :], axis=2).reshape(B * S, H)         # (BS, H) f32

    # ---- attention output projection + residual + LayerNorm ----
    h1 = _ln(x + _mm(ctx, wo) + bo, ln1_g, ln1_b)

    # ---- FFN (GELU) + residual + LayerNorm ----
    a = jax.nn.gelu(_mm(h1, w1) + b1, approximate=True)
    # TODO(synk): PyTorch nn.GELU defaults to the exact erf GELU; tanh approximation used here.
    y = _ln(h1 + _mm(a, w2) + b2, ln2_g, ln2_b)                           # (BS, H) f32

    # ---- pooler over [CLS] + dropout (eval-mode identity) + classifier ----
    cls = y.reshape(B, S, H)[:, 0, :]                                     # (B, H)
    pooled = jnp.tanh(_mm(cls, wp) + bp)
    logits_ref[...] = _mm(pooled, wc) + bc                                # (B, 128)


def bert_fused(emb_sum, neg, wslab, pslab):
    B = neg.shape[0]
    vmem = pl.BlockSpec(memory_space=pltpu.MemorySpace.VMEM)
    # TODO(synk): on v7x (2 TensorCores) the batch could be split across a core_map mesh;
    # at this toy size (<100 KiB total) a single gridless invocation on one core is best.
    return pl.pallas_call(
        bert_fused_kernel,
        out_shape=jax.ShapeDtypeStruct((B, LOGIT_PAD), jnp.float32),
        in_specs=[vmem] * 4,
        out_specs=vmem,
    )(emb_sum, neg, wslab, pslab)


# ---------------- host-side weight packing (run ONCE, outside the jit) -------
def pack_weights(params):
    H, F = HIDDEN, FFN
    t = lambda w: jnp.transpose(w)     # PyTorch (out, in) -> (in, out)

    wslab = jnp.zeros((SLAB_ROWS, SLAB_COLS), jnp.float32)
    wslab = wslab.at[:H, C_QKV:C_QKV + 3 * H].set(
        jnp.concatenate([t(params['wq']), t(params['wk']), t(params['wv'])], axis=1))
    wslab = wslab.at[:H, C_W1:C_W1 + F].set(t(params['w1']))
    wslab = wslab.at[:H, C_WO:C_WO + H].set(t(params['wo']))
    wslab = wslab.at[:F, C_W2:C_W2 + H].set(t(params['w2']))
    wslab = wslab.at[:H, C_WP:C_WP + H].set(t(params['pooler_w']))
    wslab = wslab.at[:H, C_WC:C_WC + NUM_CLASSES].set(t(params['cls_w']))
    head_ids = jnp.arange(H) // HEAD_DIM
    wslab = wslab.at[:H, C_E:C_E + H].set(
        (head_ids[:, None] == head_ids[None, :]).astype(jnp.float32))
    wslab = wslab.astype(jnp.bfloat16)

    pslab = jnp.zeros((P_ROWS, LOGIT_PAD), jnp.float32)

    def setrow(slab, r, vec):
        vec = jnp.asarray(vec).reshape(-1)
        return slab.at[r, :vec.shape[0]].set(vec)

    pslab = setrow(pslab, R_EMB_G, params['emb_ln_g'])
    pslab = setrow(pslab, R_EMB_B, params['emb_ln_b'])
    pslab = setrow(pslab, R_BQKV, jnp.concatenate(
        [params['bq'], params['bk'], params['bv']], axis=1))
    pslab = setrow(pslab, R_BO, params['bo'])
    pslab = setrow(pslab, R_LN1G, params['ln1_g'])
    pslab = setrow(pslab, R_LN1B, params['ln1_b'])
    pslab = setrow(pslab, R_B1, params['b1'])
    pslab = setrow(pslab, R_B2, params['b2'])
    pslab = setrow(pslab, R_LN2G, params['ln2_g'])
    pslab = setrow(pslab, R_LN2B, params['ln2_b'])
    pslab = setrow(pslab, R_BP, params['pooler_b'])
    pslab = setrow(pslab, R_BC, params['cls_b'])
    return wslab, pslab


# ------------------------------ JAX glue --------------------------------------
def bert_classifier_forward(token_ids, valid_length, segment_ids,
                            word_emb, pos_emb, type_emb, wslab, pslab):
    B, S = token_ids.shape
    # gen_attention_mask: mask[i, :valid_length[i]] = 1.0; pass additive term to kernel
    positions = jnp.arange(S, dtype=jnp.int32)
    attention_mask = (positions[None, :] < valid_length[:, None]).astype(jnp.float32)
    neg = (1.0 - attention_mask) * (-1e9)                                 # (B, S)

    # embeddings (gather glue); embedding LayerNorm happens inside the Pallas kernel
    word = jnp.take(word_emb, token_ids, axis=0)
    pos = pos_emb[None, :S, :]
    tok = jnp.take(type_emb, segment_ids, axis=0)
    emb_sum = (word + pos + tok).astype(jnp.float32).reshape(B * S, HIDDEN)

    return bert_fused(emb_sum, neg, wslab, pslab)[:, :NUM_CLASSES]


# -------------------------- deterministic params ------------------------------
def init_params(key):
    keys = jax.random.split(key, 12)

    def nrm(k, shape):
        return jax.random.normal(k, shape, jnp.float32) * 0.02

    zeros = lambda s: jnp.zeros(s, jnp.float32)
    ones = lambda s: jnp.ones(s, jnp.float32)
    return dict(
        word_emb=nrm(keys[0], (VOCAB, HIDDEN)),
        pos_emb=nrm(keys[1], (SEQ, HIDDEN)),
        type_emb=nrm(keys[2], (NUM_TYPES, HIDDEN)),
        emb_ln_g=ones((1, HIDDEN)), emb_ln_b=zeros((1, HIDDEN)),
        wq=nrm(keys[3], (HIDDEN, HIDDEN)), bq=zeros((1, HIDDEN)),
        wk=nrm(keys[4], (HIDDEN, HIDDEN)), bk=zeros((1, HIDDEN)),
        wv=nrm(keys[5], (HIDDEN, HIDDEN)), bv=zeros((1, HIDDEN)),
        wo=nrm(keys[6], (HIDDEN, HIDDEN)), bo=zeros((1, HIDDEN)),
        ln1_g=ones((1, HIDDEN)), ln1_b=zeros((1, HIDDEN)),
        w1=nrm(keys[7], (FFN, HIDDEN)), b1=zeros((1, FFN)),
        w2=nrm(keys[8], (HIDDEN, FFN)), b2=zeros((1, HIDDEN)),
        ln2_g=ones((1, HIDDEN)), ln2_b=zeros((1, HIDDEN)),
        pooler_w=nrm(keys[9], (HIDDEN, HIDDEN)), pooler_b=zeros((1, HIDDEN)),
        cls_w=nrm(keys[10], (NUM_CLASSES, HIDDEN)), cls_b=zeros((1, NUM_CLASSES)),
    )


if __name__ == "__main__":
    key = jax.random.PRNGKey(0)
    pkey, dkey = jax.random.split(key)
    params = init_params(pkey)

    # weight packing hoisted out of the per-call jit path (static across calls)
    wslab, pslab = pack_weights(params)

    B = 2
    token_ids = jax.random.randint(dkey, (B, SEQ), 0, VOCAB, dtype=jnp.int32)
    valid_length = jnp.array([SEQ, SEQ - 3], dtype=jnp.int32)
    segment_ids = jnp.zeros((B, SEQ), dtype=jnp.int32)

    forward = jax.jit(bert_classifier_forward)
    logits = forward(token_ids, valid_length, segment_ids,
                     params['word_emb'], params['pos_emb'], params['type_emb'],
                     wslab, pslab)
    jax.block_until_ready(logits)
    assert logits.shape == (B, NUM_CLASSES) and logits.dtype == jnp.float32
    print("KERNEL_OK")
</pallas_src>

<mosaic_0001>
module attributes {stable_mosaic.version = 11 : i64} {
  func.func @bert_fused_kernel(%arg0: memref<16x32xf32, #tpu.memory_space<vmem>>, %arg1: memref<2x8xf32, #tpu.memory_space<vmem>>, %arg2: memref<64x416xbf16, #tpu.memory_space<vmem>>, %arg3: memref<16x128xf32, #tpu.memory_space<vmem>>, %arg4: memref<2x128xf32, #tpu.memory_space<vmem>>) attributes {dimension_semantics = [], scalar_prefetch = 0 : i64, scratch_operands = 0 : i64, tpu.core_type = #tpu.core_type<tc>} {
    %c0 = arith.constant 0 : index
    %c0_0 = arith.constant 0 : index
    %0 = vector.load %arg2[%c0, %c0_0] : memref<64x416xbf16, #tpu.memory_space<vmem>>, vector<32x96xbf16>
    %c0_1 = arith.constant 0 : index
    %c96 = arith.constant 96 : index
    %1 = vector.load %arg2[%c0_1, %c96] : memref<64x416xbf16, #tpu.memory_space<vmem>>, vector<32x64xbf16>
    %c0_2 = arith.constant 0 : index
    %c160 = arith.constant 160 : index
    %2 = vector.load %arg2[%c0_2, %c160] : memref<64x416xbf16, #tpu.memory_space<vmem>>, vector<32x32xbf16>
    %c0_3 = arith.constant 0 : index
    %c192 = arith.constant 192 : index
    %3 = vector.load %arg2[%c0_3, %c192] : memref<64x416xbf16, #tpu.memory_space<vmem>>, vector<64x32xbf16>
    %c0_4 = arith.constant 0 : index
    %c224 = arith.constant 224 : index
    %4 = vector.load %arg2[%c0_4, %c224] : memref<64x416xbf16, #tpu.memory_space<vmem>>, vector<32x32xbf16>
    %c0_5 = arith.constant 0 : index
    %c256 = arith.constant 256 : index
    %5 = vector.load %arg2[%c0_5, %c256] : memref<64x416xbf16, #tpu.memory_space<vmem>>, vector<32x128xbf16>
    %c0_6 = arith.constant 0 : index
    %c384 = arith.constant 384 : index
    %6 = vector.load %arg2[%c0_6, %c384] : memref<64x416xbf16, #tpu.memory_space<vmem>>, vector<32x32xbf16>
    %c0_7 = arith.constant 0 : index
    %c0_8 = arith.constant 0 : index
    %7 = vector.load %arg3[%c0_7, %c0_8] : memref<16x128xf32, #tpu.memory_space<vmem>>, vector<1x32xf32>
    %c1 = arith.constant 1 : index
    %c0_9 = arith.constant 0 : index
    %8 = vector.load %arg3[%c1, %c0_9] : memref<16x128xf32, #tpu.memory_space<vmem>>, vector<1x32xf32>
    %c2 = arith.constant 2 : index
    %c0_10 = arith.constant 0 : index
    %9 = vector.load %arg3[%c2, %c0_10] : memref<16x128xf32, #tpu.memory_space<vmem>>, vector<1x96xf32>
    %c3 = arith.constant 3 : index
    %c0_11 = arith.constant 0 : index
    %10 = vector.load %arg3[%c3, %c0_11] : memref<16x128xf32, #tpu.memory_space<vmem>>, vector<1x32xf32>
    %c4 = arith.constant 4 : index
    %c0_12 = arith.constant 0 : index
    %11 = vector.load %arg3[%c4, %c0_12] : memref<16x128xf32, #tpu.memory_space<vmem>>, vector<1x32xf32>
    %c5 = arith.constant 5 : index
    %c0_13 = arith.constant 0 : index
    %12 = vector.load %arg3[%c5, %c0_13] : memref<16x128xf32, #tpu.memory_space<vmem>>, vector<1x32xf32>
    %c6 = arith.constant 6 : index
    %c0_14 = arith.constant 0 : index
    %13 = vector.load %arg3[%c6, %c0_14] : memref<16x128xf32, #tpu.memory_space<vmem>>, vector<1x64xf32>
    %c7 = arith.constant 7 : index
    %c0_15 = arith.constant 0 : index
    %14 = vector.load %arg3[%c7, %c0_15] : memref<16x128xf32, #tpu.memory_space<vmem>>, vector<1x32xf32>
    %c8 = arith.constant 8 : index
    %c0_16 = arith.constant 0 : index
    %15 = vector.load %arg3[%c8, %c0_16] : memref<16x128xf32, #tpu.memory_space<vmem>>, vector<1x32xf32>
    %c9 = arith.constant 9 : index
    %c0_17 = arith.constant 0 : index
    %16 = vector.load %arg3[%c9, %c0_17] : memref<16x128xf32, #tpu.memory_space<vmem>>, vector<1x32xf32>
    %c10 = arith.constant 10 : index
    %c0_18 = arith.constant 0 : index
    %17 = vector.load %arg3[%c10, %c0_18] : memref<16x128xf32, #tpu.memory_space<vmem>>, vector<1x32xf32>
    %c11 = arith.constant 11 : index
    %c0_19 = arith.constant 0 : index
    %18 = vector.load %arg3[%c11, %c0_19] : memref<16x128xf32, #tpu.memory_space<vmem>>, vector<1x128xf32>
    %c0_20 = arith.constant 0 : index
    %c0_21 = arith.constant 0 : index
    %19 = vector.load %arg0[%c0_20, %c0_21] : memref<16x32xf32, #tpu.memory_space<vmem>>, vector<16x32xf32>
    %cst = arith.constant dense<0.000000e+00> : vector<16xf32>
    %20 = vector.multi_reduction <add>, %19, %cst [1] : vector<16x32xf32> to vector<16xf32>
    %21 = vector.shape_cast %20 : vector<16xf32> to vector<16x1xf32>
    %cst_22 = arith.constant 3.200000e+01 : f32
    %22 = vector.broadcast %cst_22 : f32 to vector<16x1xf32>
    %23 = arith.divf %21, %22 : vector<16x1xf32>
    %24 = vector.broadcast %23 : vector<16x1xf32> to vector<16x32xf32>
    %25 = arith.subf %19, %24 : vector<16x32xf32>
    %26 = arith.mulf %25, %25 : vector<16x32xf32>
    %cst_23 = arith.constant dense<0.000000e+00> : vector<16xf32>
    %27 = vector.multi_reduction <add>, %26, %cst_23 [1] : vector<16x32xf32> to vector<16xf32>
    %28 = vector.shape_cast %27 : vector<16xf32> to vector<16x1xf32>
    %cst_24 = arith.constant 3.200000e+01 : f32
    %29 = vector.broadcast %cst_24 : f32 to vector<16x1xf32>
    %30 = arith.divf %28, %29 : vector<16x1xf32>
    %31 = vector.broadcast %23 : vector<16x1xf32> to vector<16x32xf32>
    %32 = arith.subf %19, %31 : vector<16x32xf32>
    %cst_25 = arith.constant 9.99999996E-13 : f32
    %33 = vector.broadcast %cst_25 : f32 to vector<16x1xf32>
    %34 = arith.addf %30, %33 : vector<16x1xf32>
    %35 = math.rsqrt %34 : vector<16x1xf32>
    %36 = vector.broadcast %35 : vector<16x1xf32> to vector<16x32xf32>
    %37 = arith.mulf %32, %36 : vector<16x32xf32>
    %38 = vector.broadcast %7 : vector<1x32xf32> to vector<16x32xf32>
    %39 = arith.mulf %37, %38 : vector<16x32xf32>
    %40 = vector.broadcast %8 : vector<1x32xf32> to vector<16x32xf32>
    %41 = arith.addf %39, %40 : vector<16x32xf32>
    %42 = arith.truncf %41 : vector<16x32xf32> to vector<16x32xbf16>
    %cst_26 = arith.constant dense<0.000000e+00> : vector<16x96xf32>
    %43 = tpu.matmul %42, %0, %cst_26 {dimension_numbers = #tpu.dot_dimension_numbers<[1], [0], [0], [1], [0, 0, 1, 1], [], []>} : vector<16x32xbf16>, vector<32x96xbf16>, vector<16x96xf32> -> vector<16x96xf32>
    %44 = vector.broadcast %9 : vector<1x96xf32> to vector<16x96xf32>
    %45 = arith.addf %43, %44 : vector<16x96xf32>
    %46 = vector.extract_strided_slice %45 {offsets = [0, 0], sizes = [16, 32], strides = [1, 1]} : vector<16x96xf32> to vector<16x32xf32>
    %cst_27 = arith.constant 0.353553385 : f32
    %47 = vector.broadcast %cst_27 : f32 to vector<16x32xf32>
    %48 = arith.mulf %46, %47 : vector<16x32xf32>
    %49 = vector.shape_cast %48 : vector<16x32xf32> to vector<2x8x32xf32>
    %50 = vector.extract_strided_slice %45 {offsets = [0, 32], sizes = [16, 32], strides = [1, 1]} : vector<16x96xf32> to vector<16x32xf32>
    %51 = vector.shape_cast %50 : vector<16x32xf32> to vector<2x8x32xf32>
    %52 = vector.extract_strided_slice %45 {offsets = [0, 64], sizes = [16, 32], strides = [1, 1]} : vector<16x96xf32> to vector<16x32xf32>
    %53 = vector.shape_cast %52 : vector<16x32xf32> to vector<2x8x32xf32>
    %54 = vector.shape_cast %49 : vector<2x8x32xf32> to vector<2x8x1x32xf32>
    %55 = vector.shape_cast %51 : vector<2x8x32xf32> to vector<2x1x8x32xf32>
    %56 = vector.broadcast %54 : vector<2x8x1x32xf32> to vector<2x8x8x32xf32>
    %57 = vector.broadcast %55 : vector<2x1x8x32xf32> to vector<2x8x8x32xf32>
    %58 = arith.mulf %56, %57 : vector<2x8x8x32xf32>
    %59 = vector.shape_cast %58 : vector<2x8x8x32xf32> to vector<128x32xf32>
    %60 = arith.truncf %59 : vector<128x32xf32> to vector<128x32xbf16>
    %cst_28 = arith.constant dense<0.000000e+00> : vector<128x32xf32>
    %61 = tpu.matmul %60, %6, %cst_28 {dimension_numbers = #tpu.dot_dimension_numbers<[1], [0], [0], [1], [0, 0, 1, 1], [], []>} : vector<128x32xbf16>, vector<32x32xbf16>, vector<128x32xf32> -> vector<128x32xf32>
    %62 = vector.shape_cast %61 : vector<128x32xf32> to vector<2x8x8x32xf32>
    %c0_29 = arith.constant 0 : index
    %c0_30 = arith.constant 0 : index
    %63 = vector.load %arg1[%c0_29, %c0_30] : memref<2x8xf32, #tpu.memory_space<vmem>>, vector<2x8xf32>
    %64 = vector.shape_cast %63 : vector<2x8xf32> to vector<2x1x8x1xf32>
    %65 = vector.broadcast %64 : vector<2x1x8x1xf32> to vector<2x8x8x32xf32>
    %66 = arith.addf %62, %65 : vector<2x8x8x32xf32>
    %cst_31 = arith.constant dense<0xFF800000> : vector<2x8x32xf32>
    %67 = vector.multi_reduction <maximumf>, %66, %cst_31 [2] : vector<2x8x8x32xf32> to vector<2x8x32xf32>
    %68 = vector.shape_cast %67 : vector<2x8x32xf32> to vector<2x8x1x32xf32>
    %69 = vector.broadcast %68 : vector<2x8x1x32xf32> to vector<2x8x8x32xf32>
    %70 = arith.subf %66, %69 : vector<2x8x8x32xf32>
    %71 = math.exp %70 : vector<2x8x8x32xf32>
    %cst_32 = arith.constant dense<0.000000e+00> : vector<2x8x32xf32>
    %72 = vector.multi_reduction <add>, %71, %cst_32 [2] : vector<2x8x8x32xf32> to vector<2x8x32xf32>
    %73 = vector.shape_cast %72 : vector<2x8x32xf32> to vector<2x8x1x32xf32>
    %74 = tpu.reciprocal %73 {approx = true} : vector<2x8x1x32xf32> -> vector<2x8x1x32xf32>
    %75 = vector.broadcast %74 : vector<2x8x1x32xf32> to vector<2x8x8x32xf32>
    %76 = arith.mulf %71, %75 : vector<2x8x8x32xf32>
    %77 = vector.shape_cast %53 : vector<2x8x32xf32> to vector<2x1x8x32xf32>
    %78 = vector.broadcast %77 : vector<2x1x8x32xf32> to vector<2x8x8x32xf32>
    %79 = arith.mulf %76, %78 : vector<2x8x8x32xf32>
    %cst_33 = arith.constant dense<0.000000e+00> : vector<2x8x32xf32>
    %80 = vector.multi_reduction <add>, %79, %cst_33 [2] : vector<2x8x8x32xf32> to vector<2x8x32xf32>
    %81 = vector.shape_cast %80 : vector<2x8x32xf32> to vector<16x32xf32>
    %82 = arith.truncf %81 : vector<16x32xf32> to vector<16x32xbf16>
    %cst_34 = arith.constant dense<0.000000e+00> : vector<16x32xf32>
    %83 = tpu.matmul %82, %2, %cst_34 {dimension_numbers = #tpu.dot_dimension_numbers<[1], [0], [0], [1], [0, 0, 1, 1], [], []>} : vector<16x32xbf16>, vector<32x32xbf16>, vector<16x32xf32> -> vector<16x32xf32>
    %84 = arith.addf %41, %83 : vector<16x32xf32>
    %85 = vector.broadcast %10 : vector<1x32xf32> to vector<16x32xf32>
    %86 = arith.addf %84, %85 : vector<16x32xf32>
    %cst_35 = arith.constant dense<0.000000e+00> : vector<16xf32>
    %87 = vector.multi_reduction <add>, %86, %cst_35 [1] : vector<16x32xf32> to vector<16xf32>
    %88 = vector.shape_cast %87 : vector<16xf32> to vector<16x1xf32>
    %cst_36 = arith.constant 3.200000e+01 : f32
    %89 = vector.broadcast %cst_36 : f32 to vector<16x1xf32>
    %90 = arith.divf %88, %89 : vector<16x1xf32>
    %91 = vector.broadcast %90 : vector<16x1xf32> to vector<16x32xf32>
    %92 = arith.subf %86, %91 : vector<16x32xf32>
    %93 = arith.mulf %92, %92 : vector<16x32xf32>
    %cst_37 = arith.constant dense<0.000000e+00> : vector<16xf32>
    %94 = vector.multi_reduction <add>, %93, %cst_37 [1] : vector<16x32xf32> to vector<16xf32>
    %95 = vector.shape_cast %94 : vector<16xf32> to vector<16x1xf32>
    %cst_38 = arith.constant 3.200000e+01 : f32
    %96 = vector.broadcast %cst_38 : f32 to vector<16x1xf32>
    %97 = arith.divf %95, %96 : vector<16x1xf32>
    %98 = vector.broadcast %90 : vector<16x1xf32> to vector<16x32xf32>
    %99 = arith.subf %86, %98 : vector<16x32xf32>
    %cst_39 = arith.constant 9.99999996E-13 : f32
    %100 = vector.broadcast %cst_39 : f32 to vector<16x1xf32>
    %101 = arith.addf %97, %100 : vector<16x1xf32>
    %102 = math.rsqrt %101 : vector<16x1xf32>
    %103 = vector.broadcast %102 : vector<16x1xf32> to vector<16x32xf32>
    %104 = arith.mulf %99, %103 : vector<16x32xf32>
    %105 = vector.broadcast %11 : vector<1x32xf32> to vector<16x32xf32>
    %106 = arith.mulf %104, %105 : vector<16x32xf32>
    %107 = vector.broadcast %12 : vector<1x32xf32> to vector<16x32xf32>
    %108 = arith.addf %106, %107 : vector<16x32xf32>
    %109 = arith.truncf %108 : vector<16x32xf32> to vector<16x32xbf16>
    %cst_40 = arith.constant dense<0.000000e+00> : vector<16x64xf32>
    %110 = tpu.matmul %109, %1, %cst_40 {dimension_numbers = #tpu.dot_dimension_numbers<[1], [0], [0], [1], [0, 0, 1, 1], [], []>} : vector<16x32xbf16>, vector<32x64xbf16>, vector<16x64xf32> -> vector<16x64xf32>
    %111 = vector.broadcast %13 : vector<1x64xf32> to vector<16x64xf32>
    %112 = arith.addf %110, %111 : vector<16x64xf32>
    %113 = arith.mulf %112, %112 : vector<16x64xf32>
    %114 = arith.mulf %112, %113 : vector<16x64xf32>
    %cst_41 = arith.constant 4.471500e-02 : f32
    %115 = vector.broadcast %cst_41 : f32 to vector<16x64xf32>
    %116 = arith.mulf %115, %114 : vector<16x64xf32>
    %117 = arith.addf %112, %116 : vector<16x64xf32>
    %cst_42 = arith.constant 0.797884583 : f32
    %118 = vector.broadcast %cst_42 : f32 to vector<16x64xf32>
    %119 = arith.mulf %118, %117 : vector<16x64xf32>
    %120 = math.tanh %119 : vector<16x64xf32>
    %cst_43 = arith.constant 1.000000e+00 : f32
    %121 = vector.broadcast %cst_43 : f32 to vector<16x64xf32>
    %122 = arith.addf %121, %120 : vector<16x64xf32>
    %cst_44 = arith.constant 5.000000e-01 : f32
    %123 = vector.broadcast %cst_44 : f32 to vector<16x64xf32>
    %124 = arith.mulf %123, %122 : vector<16x64xf32>
    %125 = arith.mulf %112, %124 : vector<16x64xf32>
    %126 = arith.truncf %125 : vector<16x64xf32> to vector<16x64xbf16>
    %cst_45 = arith.constant dense<0.000000e+00> : vector<16x32xf32>
    %127 = tpu.matmul %126, %3, %cst_45 {dimension_numbers = #tpu.dot_dimension_numbers<[1], [0], [0], [1], [0, 0, 1, 1], [], []>} : vector<16x64xbf16>, vector<64x32xbf16>, vector<16x32xf32> -> vector<16x32xf32>
    %128 = arith.addf %108, %127 : vector<16x32xf32>
    %129 = vector.broadcast %14 : vector<1x32xf32> to vector<16x32xf32>
    %130 = arith.addf %128, %129 : vector<16x32xf32>
    %cst_46 = arith.constant dense<0.000000e+00> : vector<16xf32>
    %131 = vector.multi_reduction <add>, %130, %cst_46 [1] : vector<16x32xf32> to vector<16xf32>
    %132 = vector.shape_cast %131 : vector<16xf32> to vector<16x1xf32>
    %cst_47 = arith.constant 3.200000e+01 : f32
    %133 = vector.broadcast %cst_47 : f32 to vector<16x1xf32>
    %134 = arith.divf %132, %133 : vector<16x1xf32>
    %135 = vector.broadcast %134 : vector<16x1xf32> to vector<16x32xf32>
    %136 = arith.subf %130, %135 : vector<16x32xf32>
    %137 = arith.mulf %136, %136 : vector<16x32xf32>
    %cst_48 = arith.constant dense<0.000000e+00> : vector<16xf32>
    %138 = vector.multi_reduction <add>, %137, %cst_48 [1] : vector<16x32xf32> to vector<16xf32>
    %139 = vector.shape_cast %138 : vector<16xf32> to vector<16x1xf32>
    %cst_49 = arith.constant 3.200000e+01 : f32
    %140 = vector.broadcast %cst_49 : f32 to vector<16x1xf32>
    %141 = arith.divf %139, %140 : vector<16x1xf32>
    %142 = vector.broadcast %134 : vector<16x1xf32> to vector<16x32xf32>
    %143 = arith.subf %130, %142 : vector<16x32xf32>
    %cst_50 = arith.constant 9.99999996E-13 : f32
    %144 = vector.broadcast %cst_50 : f32 to vector<16x1xf32>
    %145 = arith.addf %141, %144 : vector<16x1xf32>
    %146 = math.rsqrt %145 : vector<16x1xf32>
    %147 = vector.broadcast %146 : vector<16x1xf32> to vector<16x32xf32>
    %148 = arith.mulf %143, %147 : vector<16x32xf32>
    %149 = vector.broadcast %15 : vector<1x32xf32> to vector<16x32xf32>
    %150 = arith.mulf %148, %149 : vector<16x32xf32>
    %151 = vector.broadcast %16 : vector<1x32xf32> to vector<16x32xf32>
    %152 = arith.addf %150, %151 : vector<16x32xf32>
    %153 = vector.shape_cast %152 : vector<16x32xf32> to vector<2x8x32xf32>
    %154 = vector.extract_strided_slice %153 {offsets = [0, 0, 0], sizes = [2, 1, 32], strides = [1, 1, 1]} : vector<2x8x32xf32> to vector<2x1x32xf32>
    %155 = vector.shape_cast %154 : vector<2x1x32xf32> to vector<2x32xf32>
    %156 = arith.truncf %155 : vector<2x32xf32> to vector<2x32xbf16>
    %cst_51 = arith.constant dense<0.000000e+00> : vector<2x32xf32>
    %157 = tpu.matmul %156, %4, %cst_51 {dimension_numbers = #tpu.dot_dimension_numbers<[1], [0], [0], [1], [0, 0, 1, 1], [], []>} : vector<2x32xbf16>, vector<32x32xbf16>, vector<2x32xf32> -> vector<2x32xf32>
    %158 = vector.broadcast %17 : vector<1x32xf32> to vector<2x32xf32>
    %159 = arith.addf %157, %158 : vector<2x32xf32>
    %160 = math.tanh %159 : vector<2x32xf32>
    %161 = arith.truncf %160 : vector<2x32xf32> to vector<2x32xbf16>
    %cst_52 = arith.constant dense<0.000000e+00> : vector<2x128xf32>
    %162 = tpu.matmul %161, %5, %cst_52 {dimension_numbers = #tpu.dot_dimension_numbers<[1], [0], [0], [1], [0, 0, 1, 1], [], []>} : vector<2x32xbf16>, vector<32x128xbf16>, vector<2x128xf32> -> vector<2x128xf32>
    %163 = vector.broadcast %18 : vector<1x128xf32> to vector<2x128xf32>
    %164 = arith.addf %162, %163 : vector<2x128xf32>
    %c0_53 = arith.constant 0 : index
    %c0_54 = arith.constant 0 : index
    %165 = vector.load %arg4[%c0_53, %c0_54] : memref<2x128xf32, #tpu.memory_space<vmem>>, vector<2x128xf32>
    tpu.vector_store %arg4[%c0_53, %c0_54], %164 {strides = array<i32>} : memref<2x128xf32, #tpu.memory_space<vmem>>, vector<2x128xf32>,
    return
  }
}

</mosaic_0001>

<bundles_post_ra>
// kernel: bert_classifier_forward.1
= control target key start
LH: loop header
LB: loop body
LE: loop exit
PB: predicated region body
PF: predicated region fallthrough
CT: control target
= control target key end

     0   :  { %vm57_vm0 = vcmask 261120   ;;  %s2217_s0 = inlined_call_operand.vmem [shape: f32[16,32], index: 0, kind: input, shape index: {}]   ;;  %s2218_s1 = inlined_call_operand.vmem [shape: f32[2,8], index: 1, kind: input, shape index: {}]   ;;  %s2219_s2 = inlined_call_operand.vmem [shape: bf16[64,416], index: 2, kind: input, shape index: {}]   ;;  %s2220_s3 = inlined_call_operand.vmem [shape: f32[16,128], index: 3, kind: input, shape index: {}]   ;;  %s2221_s4 = inlined_call_operand.hbm [shape: f32[2,128], index: 4, kind: output, shape index: {}]  }
   0x1   :  { %v55_v0 = vld [vmem:[%s2217_s0] sm:$0xff]  ;;  %v56_v1 = vld [vmem:[%s2217_s0 + $0x8] sm:$0xff] }
   0x2   :  { %v58_v2 = vsel %vm57_vm0, %v55_v0, 0.0  ;;  %v61_v3 = vsel %vm57_vm0, %v56_v1, 0.0 }
   0x3   :  { %59 = vadd.xlane.f32.xlu0 %v58_v2 }
   0x7   :  { %62 = vadd.xlane.f32.xlu0 %v61_v3 }
   0x8   :  { %9 = vsyncpa [#allocation3], 0  ;;  %v1647_v14 = vld [vmem:[%s2219_s2 + $0x20] ss:$16 sps:$4 sm:$0xff]   ;;  %v1769_v15 = vmov 0.0   ;;  %vm1770_vm1 = vmmov 0   ;;  %v166_v38 = vlaneseq }
   0x9   :  { %1568 = vmatprep.subr.bf16.mxu0 %v1769_v15  ;;  %1572 = vmatprep.mubr.msk.bf16.mxu0 %vm1770_vm1, %v1769_v15  ;;  %v1648_v16 = vld [vmem:[%s2219_s2] ss:$16 sps:$4 sm:$0xff]   ;;  %v1649_v34 = vld [vmem:[%s2219_s2 + $0x2c] ss:$16 sps:$4 sm:$0xff]   ;;  %v1771_v36 = vmov 1966171168  }
   0xa   :  { %1569 = vmatpush3.bf16.msra.mxu0 %v1647_v14  ;;  %v1498_v25 = vld [vmem:[%s2220_s3] ss:$0 sm:$0xff]  ;;  %v1499_v29 = vld [vmem:[%s2220_s3 + $0x1] ss:$0 sm:$0xff]  ;;  %1576 = vmatprep.subr.bf16.mxu1 %v1649_v34  ;;  %v1650_v35 = vld [vmem:[%s2219_s2 + $0xc] ss:$16 sps:$4 sm:$0xff]   ;;  %v164_v37 = vunpack.c.l.s4 %v1771_v36 }
   0xb   :  { %1570 = vmatprep.subr.bf16.mxu0 %v1769_v15  ;;  %1577 = vmatpush3.bf16.msra.mxu1 %v1649_v34  ;;  %v167_v40 = vshrl.u32 %v166_v38, 7  ;;  %v1500_v41 = vld [vmem:[%s2220_s3 + $0x2] ss:$0 sm:$0xff]  ;;  %s1772_s6 = smov 96   ;;  %v505_v48 = vld [vmem:[%s2218_s1] sm:$0x3] }
   0xc   :  { %1578 = vmatprep.subr.bf16.mxu1 %v1650_v35  ;;  %v165_v39 = vunpack.c.0.s8 %v164_v37  ;;  %s1773_s9 = smov 64   ;;  %vm1022_vm2 = vcmask 1041409   ;;  %vm1024_vm3 = vcmask 1042434   ;;  %vm1026_vm4 = vcmask 1043459   ;;  %s1774_s17 = smov 32  }
   0xd   :  { %v1847_v45 = vsub.s32 0, %v167_v40  ;;  %v515_v55 = vsub.s32 1, %v167_v40  ;;  %vm1028_vm5 = vcmask 1044484   ;;  %vm1030_vm6 = vcmask 1045509  }
   0xe   :  { %1571 = vmatpush3.bf16.msra.mxu0 %v1648_v16  ;;  %v168_v44 = vsub.s32 %v165_v39, %v167_v40  ;;  %vm1032_vm7 = vcmask 1046534   ;;  %vm1034_vm8 = vcmask 1047559   ;;  %vm1269_vm9 = vcmask 523264  }
   0xf   :  { %1596 = vmatprep.subr.bf16.mxu0 %v1769_v15  ;;  %1579 = vmatpush3.bf16.msra.mxu1 %v1650_v35  ;;  %v509_v54 = vrot.slane %v505_v48, %v1847_v45 }
  0x10   :  { %1624 = vmatprep.subr.bf16.mxu1 %v1769_v15 }
  0x8c   :  { %v60_v4 = vpop.xlane.xlu0 %59 }
  0x8d   :  { %v65_v5 = vmul.f32 0.03125, %v60_v4  ;;  %v516_v4 = vrot.slane %v505_v48, %v515_v55 }
  0x8f   :  { %v67_v6 = vsub.f32 %v55_v0, %v65_v5 }
  0x90   :  { %v63_v7 = vpop.xlane.xlu0 %62 }
  0x91   :  { %v66_v8 = vmul.f32 0.03125, %v63_v7  ;;  %v69_v9 = vmul.f32 %v67_v6, %v67_v6 }
  0x93   :  { %v68_v10 = vsub.f32 %v56_v1, %v66_v8  ;;  %v71_v11 = vsel %vm57_vm0, %v69_v9, 0.0 }
  0x94   :  { %72 = vadd.xlane.f32.xlu1 %v71_v11  ;;  %v1652_v11 = vld [vmem:[%s2219_s2 + $0x4] ss:$16 sps:$4 sm:$0xff]  }
  0x95   :  { %v70_v12 = vmul.f32 %v68_v10, %v68_v10 }
  0x97   :  { %v74_v13 = vsel %vm57_vm0, %v70_v12, 0.0 }
  0x98   :  { %75 = vadd.xlane.f32.xlu1 %v74_v13 }
 0x11d   :  { %v73_v17 = vpop.xlane.xlu1 %72 }
 0x11e   :  { %v77_v18 = vmul.f32 0.03125, %v73_v17 }
 0x120   :  { %v79_v19 = vadd.f32 1e-12, %v77_v18 }
 0x121   :  { %v76_v20 = vpop.xlane.xlu1 %75 }
 0x122   :  { %1663 = vrsqrt.f32 %v79_v19  ;;  %v78_v21 = vmul.f32 0.03125, %v76_v20 }
 0x124   :  { %v80_v22 = vadd.f32 1e-12, %v78_v21 }
 0x126   :  { %1665 = vrsqrt.f32 %v80_v22 }
 0x12f   :  { %v1664_v23 = vpop.eup %1663 }
 0x130   :  { %v83_v24 = vmul.f32 %v1664_v23, %v67_v6 }
 0x132   :  { %v89_v28 = vmul.f32 %v1498_v25, %v83_v24 }
 0x133   :  { %v1666_v26 = vpop.eup %1665 }
 0x134   :  { %v84_v27 = vmul.f32 %v1666_v26, %v68_v10  ;;  %v1828_v31 = vadd.f32 %v1499_v29, %v89_v28  ;;  %v1651_v10 = vld [vmem:[%s2219_s2 + $0x24] ss:$16 sps:$4 sm:$0xff]  }
 0x136   :  { %v90_v30 = vmul.f32 %v1498_v25, %v84_v27 }
 0x138   :  { %v1830_v32 = vadd.f32 %v1499_v29, %v90_v30 }
 0x13a   :  { %v97_v33 = vpack.c.bf16 %v1830_v32, %v1828_v31 }
 0x13c   :  { %1573 = vmatmul.mubr.msk.bf16.vlgmr.msra.gmra.mxu0 %vm57_vm0, %v97_v33 }
 0x13d   :  { %1600 = vmatprep.mubr.msk.bf16.mxu0 %vm1770_vm1, %v1769_v15 }
 0x1fc   :  { %v151_v42 = vpop.f32.mrf.mxu0 }
 0x1fd   :  { %v152_v43 = vadd.f32 %v1500_v41, %v151_v42 }
 0x1fe   :  { %v1574_v46 = vpop.f32.mrf.mxu0 }
 0x1ff   :  { %v158_v47 = vmul.f32 0.35355338, %v152_v43  ;;  %342 = vrot.lane.b32.xlu0 %v152_v43, %s1772_s6 }
 0x200   :  { %v154_v49 = vpop.f32.mrf.mxu0 }
 0x201   :  { %v162_v50 = vcombine.high %v158_v47, %v158_v47  ;;  %v169_v51 = vrot.slane %v158_v47, %v168_v44  ;;  %v155_v52 = vadd.f32 %v1500_v41, %v154_v49 }
 0x202   :  { %v1575_v53 = vpop.f32.mrf.mxu0 }
 0x203   :  { %v176_v56 = vrot.slane %v162_v50, %v168_v44  ;;  %v177_v57 = vcombine.high %v169_v51, %v169_v51  ;;  %v159_v58 = vmul.f32 0.35355338, %v155_v52  ;;  %840 = vrot.lane.b32.xlu0 %v152_v43, %s1773_s9  ;;  %344 = vrot.lane.b32.xlu1 %v155_v52, %s1772_s6  ;;  %v185_v59 = vrot.slane %v169_v51, %v168_v44 }
 0x205   :  { %v178_v60 = vcombine.high %v176_v56, %v176_v56  ;;  %v192_v61 = vrot.slane %v176_v56, %v168_v44  ;;  %v211_v62 = vcombine.high %v159_v58, %v159_v58  ;;  %v218_v63 = vrot.slane %v159_v58, %v168_v44 }
 0x206   :  { %v199_v0 = vrot.slane %v177_v57, %v168_v44  ;;  %v207_v12 = vcombine.high %v185_v59, %v185_v59  ;;  %v263_v18 = vrot.slane %v185_v59, %v1847_v45 }
 0x207   :  { %v206_v1 = vrot.slane %v178_v60, %v168_v44  ;;  %v225_v2 = vrot.slane %v211_v62, %v168_v44  ;;  %v226_v3 = vcombine.high %v218_v63, %v218_v63  ;;  %511 = vbcast.lane.b32.xlu1 %v509_v54, 256  ;;  %v234_v5 = vrot.slane %v218_v63, %v168_v44 }
 0x208   :  { %1056 = vrot.lane.b32.xlu0 %v1651_v10, %s1772_s6  ;;  %v209_v13 = vcombine.high %v199_v0, %v199_v0  ;;  %v208_v14 = vcombine.high %v192_v61, %v192_v61  ;;  %v267_v19 = vrot.slane %v199_v0, %v1847_v45  ;;  %v271_v20 = vrot.slane %v207_v12, %v1847_v45 }
 0x209   :  { %v227_v6 = vcombine.high %v225_v2, %v225_v2  ;;  %v241_v7 = vrot.slane %v225_v2, %v168_v44  ;;  %v248_v8 = vrot.slane %v226_v3, %v168_v44  ;;  %v256_v16 = vcombine.high %v234_v5, %v234_v5 }
 0x20a   :  { %v210_v17 = vcombine.high %v206_v1, %v206_v1  ;;  %v295_v21 = vrot.slane %v234_v5, %v1847_v45  ;;  %v275_v22 = vrot.slane %v209_v13, %v1847_v45  ;;  %v279_v23 = vrot.slane %v192_v61, %v1847_v45 }
 0x20b   :  { %v255_v9 = vrot.slane %v227_v6, %v168_v44  ;;  %518 = vbcast.lane.b32.xlu1 %v516_v4, 256  ;;  %v283_v24 = vrot.slane %v206_v1, %v1847_v45  ;;  %v257_v25 = vcombine.high %v241_v7, %v241_v7  ;;  %v258_v26 = vcombine.high %v248_v8, %v248_v8 }
 0x20c   :  { %v287_v27 = vrot.slane %v208_v14, %v1847_v45  ;;  %v299_v28 = vrot.slane %v248_v8, %v1847_v45  ;;  %v291_v30 = vrot.slane %v210_v17, %v1847_v45  ;;  %v303_v33 = vrot.slane %v256_v16, %v1847_v45 }
 0x20d   :  { %v311_v34 = vrot.slane %v241_v7, %v1847_v45  ;;  %v259_v35 = vcombine.high %v255_v9, %v255_v9  ;;  %v307_v47 = vrot.slane %v258_v26, %v1847_v45  ;;  %v315_v48 = vrot.slane %v255_v9, %v1847_v45 }
 0x20f   :  { %842 = vrot.lane.b32.xlu1 %v155_v52, %s1773_s9  ;;  %v319_v52 = vrot.slane %v257_v25, %v1847_v45  ;;  %v323_v53 = vrot.slane %v259_v35, %v1847_v45 }
 0x213   :  { %1054 = vrot.lane.b32.xlu1 %v1652_v11, %s1772_s6 }
 0x271   :  { %v343_v29 = vpop.permute.xlu0 %342 }
 0x272   :  { %v348_v36 = vmul.f32 %v343_v29, %v263_v18  ;;  %v349_v37 = vmul.f32 %v343_v29, %v267_v19  ;;  %v350_v38 = vmul.f32 %v343_v29, %v271_v20  ;;  %v351_v39 = vmul.f32 %v343_v29, %v275_v22 }
 0x273   :  { %v352_v40 = vmul.f32 %v343_v29, %v279_v23  ;;  %v353_v41 = vmul.f32 %v343_v29, %v283_v24  ;;  %v354_v42 = vmul.f32 %v343_v29, %v287_v27  ;;  %v355_v43 = vmul.f32 %v343_v29, %v291_v30 }
 0x274   :  { %v364_v44 = vpack.c.bf16 %v349_v37, %v348_v36  ;;  %v365_v46 = vpack.c.bf16 %v351_v39, %v350_v38 }
 0x275   :  { %v345_v49 = vpop.permute.xlu1 %344  ;;  %v366_v50 = vpack.c.bf16 %v353_v41, %v352_v40  ;;  %v367_v51 = vpack.c.bf16 %v355_v43, %v354_v42 }
 0x276   :  { %1580 = vmatprep.mubr.msk.bf16.mxu1 %vm57_vm0, %v364_v44  ;;  %v356_v54 = vmul.f32 %v345_v49, %v295_v21  ;;  %v357_v55 = vmul.f32 %v345_v49, %v299_v28  ;;  %v358_v56 = vmul.f32 %v345_v49, %v303_v33  ;;  %v359_v57 = vmul.f32 %v345_v49, %v307_v47 }
 0x277   :  { %1581 = vmatmul.mubr.msk.bf16.vlgmr.msra.gmra.mxu1 %vm57_vm0, %v365_v46  ;;  %v360_v58 = vmul.f32 %v345_v49, %v311_v34  ;;  %v361_v59 = vmul.f32 %v345_v49, %v315_v48  ;;  %v362_v60 = vmul.f32 %v345_v49, %v319_v52  ;;  %v363_v61 = vmul.f32 %v345_v49, %v323_v53 }
 0x278   :  { %1584 = vmatprep.mubr.msk.bf16.mxu1 %vm57_vm0, %v366_v50  ;;  %v368_v62 = vpack.c.bf16 %v357_v55, %v356_v54  ;;  %v369_v63 = vpack.c.bf16 %v359_v57, %v358_v56 }
 0x279   :  { %v370_v0 = vpack.c.bf16 %v361_v59, %v360_v58  ;;  %v371_v1 = vpack.c.bf16 %v363_v61, %v362_v60  ;;  %v512_v45 = vpop.permute.xlu1 %511 }
 0x27f   :  { %1585 = vmatmul.mubr.msk.bf16.gmra.mxu1 %vm57_vm0, %v367_v51 }
 0x280   :  { %1588 = vmatprep.mubr.msk.bf16.mxu1 %vm57_vm0, %v368_v62 }
 0x287   :  { %1589 = vmatmul.mubr.msk.bf16.gmra.mxu1 %vm57_vm0, %v369_v63 }
 0x288   :  { %1592 = vmatprep.mubr.msk.bf16.mxu1 %vm57_vm0, %v370_v0 }
 0x28f   :  { %1593 = vmatmul.mubr.msk.bf16.gmra.mxu1 %vm57_vm0, %v371_v1 }
 0x290   :  { %1628 = vmatprep.mubr.msk.bf16.mxu1 %vm1770_vm1, %v1769_v15 }
 0x337   :  { %v1582_v2 = vpop.f32.mrf.mxu1 }
 0x338   :  { %v522_v3 = vadd.f32 %v1582_v2, %v512_v45 }
 0x339   :  { %v442_v4 = vpop.f32.mrf.mxu1 }
 0x33a   :  { %v550_v5 = vsel %vm57_vm0, %v522_v3, -inf  ;;  %v520_v6 = vadd.f32 %v512_v45, %v442_v4 }
 0x33b   :  { %v551_v7 = vrot.slane %v550_v5, 4  ;;  %v1583_v8 = vpop.f32.mrf.mxu1 }
 0x33c   :  { %v536_v9 = vsel %vm57_vm0, %v520_v6, -inf  ;;  %v1893_v10 = vadd.f32 %v1583_v8, %v512_v45 }
 0x33d   :  { %v552_v11 = vmax.f32 %v550_v5, %v551_v7  ;;  %v537_v12 = vrot.slane %v536_v9, 4  ;;  %v445_v13 = vpop.f32.mrf.mxu1  ;;  %v1918_v7 = vpop.permute.xlu1 %518 }
 0x33e   :  { %v557_v14 = vsel %vm57_vm0, %v1893_v10, -inf  ;;  %v1897_v16 = vadd.f32 %v512_v45, %v445_v13 }
 0x33f   :  { %v553_v17 = vrot.slane %v552_v11, 2  ;;  %v538_v18 = vmax.f32 %v536_v9, %v537_v12  ;;  %v558_v19 = vrot.slane %v557_v14, 4  ;;  %v1586_v20 = vpop.f32.mrf.mxu1 }
 0x340   :  { %v543_v21 = vsel %vm57_vm0, %v1897_v16, -inf  ;;  %v1901_v22 = vadd.f32 %v1586_v20, %v512_v45 }
 0x341   :  { %v554_v23 = vmax.f32 %v552_v11, %v553_v17  ;;  %v539_v24 = vrot.slane %v538_v18, 2  ;;  %v559_v25 = vmax.f32 %v557_v14, %v558_v19  ;;  %v544_v26 = vrot.slane %v543_v21, 4  ;;  %v458_v27 = vpop.f32.mrf.mxu1 }
 0x342   :  { %v578_v28 = vsel %vm57_vm0, %v1901_v22, -inf  ;;  %v1905_v29 = vadd.f32 %v512_v45, %v458_v27 }
 0x343   :  { %v555_v30 = vrot.slane %v554_v23, 1  ;;  %v540_v33 = vmax.f32 %v538_v18, %v539_v24  ;;  %v560_v34 = vrot.slane %v559_v25, 2  ;;  %v545_v35 = vmax.f32 %v543_v21, %v544_v26  ;;  %v1587_v36 = vpop.f32.mrf.mxu1 }
 0x344   :  { %v579_v37 = vrot.slane %v578_v28, 4  ;;  %v564_v38 = vsel %vm57_vm0, %v1905_v29, -inf  ;;  %v1909_v39 = vadd.f32 %v1587_v36, %v512_v45 }
 0x345   :  { %v556_v40 = vmax.f32 %v554_v23, %v555_v30  ;;  %v541_v41 = vrot.slane %v540_v33, 1  ;;  %v561_v42 = vmax.f32 %v559_v25, %v560_v34  ;;  %v546_v43 = vrot.slane %v545_v35, 2  ;;  %v461_v44 = vpop.f32.mrf.mxu1 }
 0x346   :  { %v580_v46 = vmax.f32 %v578_v28, %v579_v37  ;;  %v565_v47 = vrot.slane %v564_v38, 4  ;;  %v585_v48 = vsel %vm57_vm0, %v1909_v39, -inf  ;;  %v1913_v49 = vadd.f32 %v512_v45, %v461_v44  ;;  %v1943_v44 = vpop.permute.xlu1 %842 }
 0x347   :  { %v650_v50 = vsub.f32 %v522_v3, %v556_v40  ;;  %v542_v51 = vmax.f32 %v540_v33, %v541_v41  ;;  %v562_v52 = vrot.slane %v561_v42, 1  ;;  %v547_v53 = vmax.f32 %v545_v35, %v546_v43  ;;  %v1590_v54 = vpop.f32.mrf.mxu1  ;;  %v1935_v35 = vpop.permute.xlu0 %840 }
 0x348   :  { %v581_v55 = vrot.slane %v580_v46, 2  ;;  %v566_v56 = vmax.f32 %v564_v38, %v565_v47  ;;  %v586_v57 = vrot.slane %v585_v48, 4  ;;  %v571_v58 = vsel %vm57_vm0, %v1913_v49, -inf }
 0x349   :  { %v668_v59 = vmul.f32 1.442695, %v650_v50  ;;  %v648_v60 = vsub.f32 %v520_v6, %v542_v51  ;;  %v563_v61 = vmax.f32 %v561_v42, %v562_v52  ;;  %v548_v62 = vrot.slane %v547_v53, 1  ;;  %v474_v63 = vpop.f32.mrf.mxu1 }
 0x34a   :  { %v582_v0 = vmax.f32 %v580_v46, %v581_v55  ;;  %v567_v1 = vrot.slane %v566_v56, 2  ;;  %v587_v45 = vmax.f32 %v585_v48, %v586_v57  ;;  %v572_v2 = vrot.slane %v571_v58, 4 }
 0x34b   :  { %1667 = vpow2.f32 %v668_v59  ;;  %v664_v3 = vmul.f32 1.442695, %v648_v60  ;;  %v651_v4 = vsub.f32 %v1893_v10, %v563_v61  ;;  %v549_v5 = vmax.f32 %v547_v53, %v548_v62  ;;  %v1591_v13 = vpop.f32.mrf.mxu1 }
 0x34c   :  { %v583_v8 = vrot.slane %v582_v0, 1  ;;  %v568_v9 = vmax.f32 %v566_v56, %v567_v1  ;;  %v588_v11 = vrot.slane %v587_v45, 2  ;;  %v573_v12 = vmax.f32 %v571_v58, %v572_v2  ;;  %v1057_v56 = vpop.permute.xlu0 %1056 }
 0x34d   :  { %1669 = vpow2.f32 %v664_v3  ;;  %v670_v6 = vmul.f32 1.442695, %v651_v4  ;;  %v649_v14 = vsub.f32 %v1897_v16, %v549_v5  ;;  %v1922_v17 = vadd.f32 %v1590_v54, %v1918_v7  ;;  %v477_v28 = vpop.f32.mrf.mxu1  ;;  %1597 = vmatpush3.bf16.msra.mxu0 %v1057_v56 }
 0x34e   :  { %v584_v18 = vmax.f32 %v582_v0, %v583_v8  ;;  %v569_v19 = vrot.slane %v568_v9, 1  ;;  %v589_v20 = vmax.f32 %v587_v45, %v588_v11  ;;  %v574_v21 = vrot.slane %v573_v12, 2  ;;  %1598 = vmatprep.subr.bf16.mxu0 %v1769_v15 }
 0x34f   :  { %1671 = vpow2.f32 %v670_v6  ;;  %v666_v10 = vmul.f32 1.442695, %v649_v14  ;;  %v606_v23 = vsel %vm57_vm0, %v1922_v17, -inf  ;;  %v1927_v24 = vadd.f32 %v1918_v7, %v474_v63  ;;  %v1594_v60 = vpop.f32.mrf.mxu1  ;;  %v1055_v63 = vpop.permute.xlu1 %1054 }
 0x350   :  { %v654_v25 = vsub.f32 %v1901_v22, %v584_v18  ;;  %v570_v26 = vmax.f32 %v568_v9, %v569_v19  ;;  %v590_v27 = vrot.slane %v589_v20, 1  ;;  %v575_v16 = vmax.f32 %v573_v12, %v574_v21 }
 0x351   :  { %1673 = vpow2.f32 %v666_v10  ;;  %v607_v30 = vrot.slane %v606_v23, 4  ;;  %v592_v33 = vsel %vm57_vm0, %v1927_v24, -inf  ;;  %v1933_v34 = vadd.f32 %v1591_v13, %v1918_v7  ;;  %1599 = vmatpush3.bf16.msra.mxu0 %v1055_v63 }
 0x352   :  { %v676_v36 = vmul.f32 1.442695, %v654_v25  ;;  %v652_v37 = vsub.f32 %v1905_v29, %v570_v26  ;;  %v591_v38 = vmax.f32 %v589_v20, %v590_v27  ;;  %v576_v40 = vrot.slane %v575_v16, 1  ;;  %1604 = vmatprep.subr.bf16.mxu0 %v1769_v15 }
 0x353   :  { %v608_v22 = vmax.f32 %v606_v23, %v607_v30  ;;  %v593_v41 = vrot.slane %v592_v33, 4  ;;  %v613_v42 = vsel %vm57_vm0, %v1933_v34, -inf  ;;  %v1941_v43 = vadd.f32 %v1918_v7, %v477_v28 }
 0x354   :  { %1675 = vpow2.f32 %v676_v36  ;;  %v672_v46 = vmul.f32 1.442695, %v652_v37  ;;  %v655_v47 = vsub.f32 %v1909_v39, %v591_v38  ;;  %v577_v48 = vmax.f32 %v575_v16, %v576_v40 }
 0x355   :  { %v609_v50 = vrot.slane %v608_v22, 2  ;;  %v594_v51 = vmax.f32 %v592_v33, %v593_v41  ;;  %v614_v29 = vrot.slane %v613_v42, 4  ;;  %v599_v52 = vsel %vm57_vm0, %v1941_v43, -inf }
 0x356   :  { %1677 = vpow2.f32 %v672_v46  ;;  %v678_v53 = vmul.f32 1.442695, %v655_v47  ;;  %v653_v54 = vsub.f32 %v1913_v49, %v577_v48  ;;  %v600_v55 = vrot.slane %v599_v52, 4 }
 0x357   :  { %v610_v57 = vmax.f32 %v608_v22, %v609_v50  ;;  %v595_v58 = vrot.slane %v594_v51, 2  ;;  %v615_v59 = vmax.f32 %v613_v42, %v614_v29  ;;  %v1957_v5 = vadd.f32 %v1594_v60, %v1918_v7 }
 0x358   :  { %v1949_v61 = vpop.eup %1667  ;;  %1679 = vpow2.f32 %v678_v53  ;;  %v674_v39 = vmul.f32 1.442695, %v653_v54  ;;  %v601_v62 = vmax.f32 %v599_v52, %v600_v55 }
 0x359   :  { %v710_v0 = vsel %vm57_vm0, %v1949_v61, 0.0  ;;  %v611_v1 = vrot.slane %v610_v57, 1  ;;  %v596_v49 = vmax.f32 %v594_v51, %v595_v58  ;;  %v616_v45 = vrot.slane %v615_v59, 2 }
 0x35a   :  { %v1954_v2 = vpop.eup %1669  ;;  %v711_v3 = vrot.slane %v710_v0, 4  ;;  %1681 = vpow2.f32 %v674_v39  ;;  %v602_v4 = vrot.slane %v601_v62, 2  ;;  %v634_v33 = vsel %vm57_vm0, %v1957_v5, -inf }
 0x35b   :  { %v696_v8 = vsel %vm57_vm0, %v1954_v2, 0.0  ;;  %v612_v9 = vmax.f32 %v610_v57, %v611_v1  ;;  %v597_v11 = vrot.slane %v596_v49, 1  ;;  %v617_v12 = vmax.f32 %v615_v59, %v616_v45 }
 0x35c   :  { %v1961_v13 = vpop.eup %1671  ;;  %v712_v6 = vadd.f32 %v711_v3, %v710_v0  ;;  %v697_v14 = vrot.slane %v696_v8, 4  ;;  %v603_v18 = vmax.f32 %v601_v62, %v602_v4  ;;  %v635_v53 = vrot.slane %v634_v33, 4 }
 0x35d   :  { %v717_v19 = vsel %vm57_vm0, %v1961_v13, 0.0  ;;  %v658_v20 = vsub.f32 %v1922_v17, %v612_v9  ;;  %v598_v21 = vmax.f32 %v596_v49, %v597_v11  ;;  %v618_v10 = vrot.slane %v617_v12, 1 }
 0x35e   :  { %v1967_v23 = vpop.eup %1673  ;;  %v713_v25 = vrot.slane %v712_v6, 2  ;;  %v698_v26 = vadd.f32 %v697_v14, %v696_v8  ;;  %v718_v27 = vrot.slane %v717_v19, 4  ;;  %v604_v16 = vrot.slane %v603_v18, 1 }
 0x35f   :  { %v703_v28 = vsel %vm57_vm0, %v1967_v23, 0.0  ;;  %v656_v30 = vsub.f32 %v1927_v24, %v598_v21  ;;  %v684_v22 = vmul.f32 1.442695, %v658_v20  ;;  %v619_v42 = vmax.f32 %v617_v12, %v618_v10 }
 0x360   :  { %v714_v36 = vadd.f32 %v713_v25, %v712_v6  ;;  %v699_v37 = vrot.slane %v698_v26, 2  ;;  %v719_v38 = vadd.f32 %v718_v27, %v717_v19  ;;  %v704_v17 = vrot.slane %v703_v28, 4 }
 0x361   :  { %v1974_v40 = vpop.eup %1675  ;;  %v680_v41 = vmul.f32 1.442695, %v656_v30  ;;  %v605_v46 = vmax.f32 %v603_v18, %v604_v16  ;;  %1683 = vpow2.f32 %v684_v22  ;;  %v659_v39 = vsub.f32 %v1933_v34, %v619_v42 }
 0x362   :  { %v715_v47 = vrot.slane %v714_v36, 1  ;;  %v700_v48 = vadd.f32 %v699_v37, %v698_v26  ;;  %v720_v50 = vrot.slane %v719_v38, 2  ;;  %v705_v51 = vadd.f32 %v704_v17, %v703_v28 }
 0x363   :  { %v1976_v29 = vpop.eup %1677  ;;  %v738_v24 = vsel %vm57_vm0, %v1974_v40, 0.0  ;;  %v657_v52 = vsub.f32 %v1941_v43, %v605_v46  ;;  %1685 = vpow2.f32 %v680_v41  ;;  %v636_v6 = vmax.f32 %v634_v33, %v635_v53 }
 0x364   :  { %v716_v54 = vadd.f32 %v715_v47, %v714_v36  ;;  %v701_v55 = vrot.slane %v700_v48, 1  ;;  %v721_v56 = vadd.f32 %v720_v50, %v719_v38  ;;  %v706_v57 = vrot.slane %v705_v51, 2  ;;  %v490_v36 = vpop.f32.mrf.mxu1 }
 0x365   :  { %v1981_v58 = vpop.eup %1679  ;;  %v739_v59 = vrot.slane %v738_v24, 4  ;;  %v724_v60 = vsel %vm57_vm0, %v1976_v29, 0.0  ;;  %v682_v3 = vmul.f32 1.442695, %v657_v52  ;;  %v637_v10 = vrot.slane %v636_v6, 2 }
 0x366   :  { %v702_v62 = vadd.f32 %v701_v55, %v700_v48  ;;  %v722_v63 = vrot.slane %v721_v56, 1  ;;  %v707_v0 = vadd.f32 %v706_v57, %v705_v51  ;;  %v725_v49 = vrot.slane %v724_v60, 4 }
 0x367   :  { %v1986_v1 = vpop.eup %1681  ;;  %v740_v43 = vadd.f32 %v739_v59, %v738_v24  ;;  %v745_v45 = vsel %vm57_vm0, %v1981_v58, 0.0  ;;  %1687 = vrcp.f32 %v716_v54  ;;  %v686_v27 = vmul.f32 1.442695, %v659_v39 }
 0x368   :  { %v723_v4 = vadd.f32 %v722_v63, %v721_v56  ;;  %v708_v8 = vrot.slane %v707_v0, 1  ;;  %v746_v9 = vrot.slane %v745_v45, 4  ;;  %v726_v12 = vadd.f32 %v725_v49, %v724_v60 }
 0x369   :  { %v741_v11 = vrot.slane %v740_v43, 2  ;;  %v731_v34 = vsel %vm57_vm0, %v1986_v1, 0.0  ;;  %1689 = vrcp.f32 %v702_v62  ;;  %v638_v30 = vmax.f32 %v636_v6, %v637_v10 }
 0x36a   :  { %v709_v14 = vadd.f32 %v708_v8, %v707_v0  ;;  %v747_v18 = vadd.f32 %v746_v9, %v745_v45  ;;  %v732_v19 = vrot.slane %v731_v34, 4  ;;  %1691 = vrcp.f32 %v723_v4 }
 0x36b   :  { %v742_v20 = vadd.f32 %v741_v11, %v740_v43  ;;  %v727_v21 = vrot.slane %v726_v12, 2  ;;  %v639_v22 = vrot.slane %v638_v30, 1  ;;  %v1993_v46 = vadd.f32 %v1918_v7, %v490_v36 }
 0x36c   :  { %1693 = vrcp.f32 %v709_v14  ;;  %v748_v25 = vrot.slane %v747_v18, 2  ;;  %v733_v26 = vadd.f32 %v732_v19, %v731_v34 }
 0x36d   :  { %v743_v16 = vrot.slane %v742_v20, 1  ;;  %v728_v28 = vadd.f32 %v727_v21, %v726_v12  ;;  %1695 = vpow2.f32 %v682_v3  ;;  %v640_v48 = vmax.f32 %v638_v30, %v639_v22 }
 0x36e   :  { %v749_v37 = vadd.f32 %v748_v25, %v747_v18  ;;  %v734_v38 = vrot.slane %v733_v26, 2  ;;  %1697 = vpow2.f32 %v686_v27  ;;  %v1995_v50 = vpop.eup %1683  ;;  %v620_v55 = vsel %vm57_vm0, %v1993_v46, -inf }
 0x36f   :  { %v744_v17 = vadd.f32 %v743_v16, %v742_v20  ;;  %v729_v33 = vrot.slane %v728_v28, 1  ;;  %v662_v54 = vsub.f32 %v1957_v5, %v640_v48  ;;  %v766_v57 = vsel %vm57_vm0, %v1995_v50, 0.0 }
 0x370   :  { %v750_v41 = vrot.slane %v749_v37, 1  ;;  %v735_v42 = vadd.f32 %v734_v38, %v733_v26  ;;  %v1997_v52 = vpop.eup %1685  ;;  %v621_v60 = vrot.slane %v620_v55, 4  ;;  %v767_v43 = vrot.slane %v766_v57, 4 }
 0x371   :  { %1699 = vrcp.f32 %v744_v17  ;;  %v730_v47 = vadd.f32 %v729_v33, %v728_v28  ;;  %v692_v63 = vmul.f32 1.442695, %v662_v54  ;;  %v752_v5 = vsel %vm57_vm0, %v1997_v52, 0.0 }
 0x372   :  { %v751_v51 = vadd.f32 %v750_v41, %v749_v37  ;;  %v736_v24 = vrot.slane %v735_v42, 1  ;;  %v622_v3 = vmax.f32 %v620_v55, %v621_v60  ;;  %v768_v12 = vadd.f32 %v767_v43, %v766_v57 }
 0x373   :  { %1701 = vrcp.f32 %v730_v47  ;;  %v753_v34 = vrot.slane %v752_v5, 4 }
 0x374   :  { %1703 = vrcp.f32 %v751_v51  ;;  %v737_v53 = vadd.f32 %v736_v24, %v735_v42  ;;  %v1688_v56 = vpop.eup %1687  ;;  %v623_v14 = vrot.slane %v622_v3, 2  ;;  %v769_v25 = vrot.slane %v768_v12, 2 }
 0x375   :  { %v826_v62 = vmul.f32 %v1688_v56, %v1949_v61  ;;  %v754_v26 = vadd.f32 %v753_v34, %v752_v5 }
 0x376   :  { %1705 = vrcp.f32 %v737_v53  ;;  %v1690_v59 = vpop.eup %1689  ;;  %v624_v22 = vmax.f32 %v622_v3, %v623_v14  ;;  %v770_v51 = vadd.f32 %v769_v25, %v768_v12 }
 0x377   :  { %v1692_v39 = vpop.eup %1691  ;;  %v824_v45 = vmul.f32 %v1690_v59, %v1954_v2  ;;  %v848_v8 = vmul.f32 %v1935_v35, %v826_v62  ;;  %1707 = vpow2.f32 %v692_v63 }
 0x378   :  { %v827_v9 = vmul.f32 %v1692_v39, %v1961_v13  ;;  %v771_v5 = vrot.slane %v770_v51, 1 }
 0x379   :  { %v1694_v0 = vpop.eup %1693  ;;  %v846_v6 = vmul.f32 %v1935_v35, %v824_v45  ;;  %v876_v19 = vsel %vm57_vm0, %v848_v8, 0.0 }
 0x37a   :  { %v825_v49 = vmul.f32 %v1694_v0, %v1967_v23  ;;  %v2009_v4 = vpop.eup %1695  ;;  %v849_v20 = vmul.f32 %v1935_v35, %v827_v9  ;;  %v877_v38 = vrot.slane %v876_v19, 4  ;;  %v625_v0 = vrot.slane %v624_v22, 1 }
 0x37b   :  { %v2014_v61 = vpop.eup %1697  ;;  %v759_v2 = vsel %vm57_vm0, %v2009_v4, 0.0  ;;  %v862_v17 = vsel %vm57_vm0, %v846_v6, 0.0 }
 0x37c   :  { %v847_v11 = vmul.f32 %v1935_v35, %v825_v49  ;;  %v773_v27 = vsel %vm57_vm0, %v2014_v61, 0.0  ;;  %v760_v36 = vrot.slane %v759_v2, 4  ;;  %v883_v41 = vsel %vm57_vm0, %v849_v20, 0.0 }
 0x37d   :  { %v774_v24 = vrot.slane %v773_v27, 4  ;;  %v878_v56 = vadd.f32 %v877_v38, %v876_v19  ;;  %v884_v57 = vrot.slane %v883_v41, 4  ;;  %v626_v14 = vmax.f32 %v624_v22, %v625_v0 }
 0x37e   :  { %v1700_v23 = vpop.eup %1699  ;;  %v869_v13 = vsel %vm57_vm0, %v847_v11, 0.0  ;;  %v761_v55 = vadd.f32 %v760_v36, %v759_v2  ;;  %v772_v20 = vadd.f32 %v771_v5, %v770_v51 }
 0x37f   :  { %v830_v21 = vmul.f32 %v1700_v23, %v1974_v40  ;;  %v870_v33 = vrot.slane %v869_v13, 4  ;;  %v1595_v40 = vpop.f32.mrf.mxu1  ;;  %v775_v45 = vadd.f32 %v774_v24, %v773_v27  ;;  %v879_v11 = vrot.slane %v878_v56, 2 }
 0x380   :  { %v1702_v18 = vpop.eup %1701  ;;  %v2036_v60 = vadd.f32 %v1595_v40, %v1918_v7  ;;  %v762_v8 = vrot.slane %v761_v55, 2  ;;  %v885_v12 = vadd.f32 %v884_v57, %v883_v41 }
 0x381   :  { %v1704_v10 = vpop.eup %1703  ;;  %v852_v16 = vmul.f32 %v1935_v35, %v830_v21  ;;  %v828_v28 = vmul.f32 %v1702_v18, %v1976_v29  ;;  %v755_v29 = vrot.slane %v754_v26, 2  ;;  %v871_v59 = vadd.f32 %v870_v33, %v869_v13  ;;  %v493_v39 = vpop.f32.mrf.mxu1 }
 0x382   :  { %v831_v30 = vmul.f32 %v1704_v10, %v1981_v58  ;;  %v863_v58 = vrot.slane %v862_v17, 4  ;;  %v2043_v9 = vadd.f32 %v1918_v7, %v493_v39  ;;  %v641_v18 = vsel %vm57_vm0, %v2036_v60, -inf }
 0x383   :  { %v1706_v37 = vpop.eup %1705  ;;  %v850_v42 = vmul.f32 %v1935_v35, %v828_v28  ;;  %v904_v62 = vsel %vm57_vm0, %v852_v16, 0.0  ;;  %v756_v3 = vadd.f32 %v755_v29, %v754_v26  ;;  %v872_v34 = vrot.slane %v871_v59, 2 }
 0x384   :  { %v853_v47 = vmul.f32 %v1935_v35, %v831_v30  ;;  %v829_v48 = vmul.f32 %v1706_v37, %v1986_v1  ;;  %v2040_v43 = vpop.eup %1707  ;;  %v905_v23 = vrot.slane %v904_v62, 4  ;;  %v776_v13 = vrot.slane %v775_v45, 2 }
 0x385   :  { %v890_v53 = vsel %vm57_vm0, %v850_v42, 0.0  ;;  %v794_v2 = vsel %vm57_vm0, %v2040_v43, 0.0  ;;  %v642_v21 = vrot.slane %v641_v18, 4  ;;  %v757_v25 = vrot.slane %v756_v3, 1 }
 0x386   :  { %v851_v54 = vmul.f32 %v1935_v35, %v829_v48  ;;  %v891_v63 = vrot.slane %v890_v53, 4  ;;  %v864_v35 = vadd.f32 %v863_v58, %v862_v17  ;;  %v763_v7 = vadd.f32 %v762_v8, %v761_v55 }
 0x387   :  { %v660_v26 = vsub.f32 %v1993_v46, %v626_v14  ;;  %v886_v27 = vrot.slane %v885_v12, 2  ;;  %v906_v16 = vadd.f32 %v905_v23, %v904_v62  ;;  %v795_v28 = vrot.slane %v794_v2, 4 }
 0x388   :  { %v897_v1 = vsel %vm57_vm0, %v851_v54, 0.0  ;;  %v892_v6 = vadd.f32 %v891_v63, %v890_v53  ;;  %v865_v10 = vrot.slane %v864_v35, 2  ;;  %v643_v30 = vmax.f32 %v641_v18, %v642_v21 }
 0x389   :  { %v898_v49 = vrot.slane %v897_v1, 4  ;;  %v880_v36 = vadd.f32 %v879_v11, %v878_v56  ;;  %v873_v37 = vadd.f32 %v872_v34, %v871_v59  ;;  %v688_v17 = vmul.f32 1.442695, %v660_v26 }
 0x38a   :  { %v893_v38 = vrot.slane %v892_v6, 2  ;;  %v911_v33 = vsel %vm57_vm0, %v853_v47, 0.0  ;;  %v644_v40 = vrot.slane %v643_v30, 2  ;;  %v627_v41 = vsel %vm57_vm0, %v2043_v9, -inf }
 0x38b   :  { %v899_v19 = vadd.f32 %v898_v49, %v897_v1  ;;  %v866_v42 = vadd.f32 %v865_v10, %v864_v35  ;;  %v764_v48 = vrot.slane %v763_v7, 1  ;;  %1709 = vpow2.f32 %v688_v17 }
 0x38c   :  { %v628_v51 = vrot.slane %v627_v41, 4  ;;  %v887_v46 = vadd.f32 %v886_v27, %v885_v12  ;;  %v907_v29 = vrot.slane %v906_v16, 2  ;;  %v796_v24 = vadd.f32 %v795_v28, %v794_v2 }
 0x38d   :  { %v900_v22 = vrot.slane %v899_v19, 2  ;;  %v645_v58 = vmax.f32 %v643_v30, %v644_v40  ;;  %v894_v53 = vadd.f32 %v893_v38, %v892_v6  ;;  %v912_v54 = vrot.slane %v911_v33, 4 }
 0x38e   :  { %v777_v55 = vadd.f32 %v776_v13, %v775_v45  ;;  %v629_v56 = vmax.f32 %v627_v41, %v628_v51  ;;  %v881_v57 = vrot.slane %v880_v36, 1  ;;  %v874_v59 = vrot.slane %v873_v37, 1 }
 0x38f   :  { %v901_v47 = vadd.f32 %v900_v22, %v899_v19  ;;  %1711 = vrcp.f32 %v772_v20  ;;  %v867_v39 = vrot.slane %v866_v42, 1  ;;  %v758_v62 = vadd.f32 %v757_v25, %v756_v3 }
 0x390   :  { %v646_v63 = vrot.slane %v645_v58, 1  ;;  %v630_v1 = vrot.slane %v629_v56, 2  ;;  %v888_v0 = vrot.slane %v887_v46, 1  ;;  %v765_v49 = vadd.f32 %v764_v48, %v763_v7 }
 0x391   :  { %v797_v5 = vrot.slane %v796_v24, 2  ;;  %v908_v35 = vadd.f32 %v907_v29, %v906_v16  ;;  %v895_v8 = vrot.slane %v894_v53, 1  ;;  %v913_v34 = vadd.f32 %v912_v54, %v911_v33 }
 0x392   :  { %v647_v11 = vmax.f32 %v645_v58, %v646_v63  ;;  %v631_v12 = vmax.f32 %v629_v56, %v630_v1  ;;  %v882_v23 = vadd.f32 %v881_v57, %v880_v36  ;;  %v875_v6 = vadd.f32 %v874_v59, %v873_v37 }
 0x393   :  { %v778_v45 = vrot.slane %v777_v55, 1  ;;  %v902_v2 = vrot.slane %v901_v47, 1  ;;  %v868_v14 = vadd.f32 %v867_v39, %v866_v42  ;;  %v914_v20 = vrot.slane %v913_v34, 2 }
 0x394   :  { %v663_v18 = vsub.f32 %v2036_v60, %v647_v11  ;;  %v632_v19 = vrot.slane %v631_v12, 1  ;;  %v889_v3 = vadd.f32 %v888_v0, %v887_v46  ;;  %1713 = vrcp.f32 %v765_v49 }
 0x395   :  { %v798_v13 = vadd.f32 %v797_v5, %v796_v24  ;;  %v909_v21 = vrot.slane %v908_v35, 1  ;;  %v896_v7 = vadd.f32 %v895_v8, %v894_v53  ;;  %v915_v26 = vadd.f32 %v914_v20, %v913_v34 }
 0x396   :  { %v694_v10 = vmul.f32 1.442695, %v663_v18  ;;  %v633_v25 = vmax.f32 %v631_v12, %v632_v19  ;;  %v975_v27 = vpack.c.bf16 %v875_v6, %v875_v6  ;;  %1715 = vrcp.f32 %v758_v62 }
 0x397   :  { %v779_v16 = vadd.f32 %v778_v45, %v777_v55  ;;  %v903_v28 = vadd.f32 %v902_v2, %v901_v47  ;;  %v976_v30 = vpack.c.bf16 %v882_v23, %v882_v23  ;;  %v916_v37 = vrot.slane %v915_v26, 1 }
 0x398   :  { %1717 = vpow2.f32 %v694_v10  ;;  %v661_v36 = vsub.f32 %v2043_v9, %v633_v25  ;;  %v2055_v60 = vpop.eup %1709  ;;  %v974_v38 = vpack.c.bf16 %v868_v14, %v868_v14  ;;  %v799_v17 = vrot.slane %v798_v13, 1 }
 0x399   :  { %v910_v33 = vadd.f32 %v909_v21, %v908_v35  ;;  %v977_v22 = vpack.c.bf16 %v889_v3, %v889_v3  ;;  %v780_v40 = vsel %vm57_vm0, %v2055_v60, 0.0  ;;  %v917_v42 = vadd.f32 %v916_v37, %v915_v26 }
 0x39a   :  { %v690_v41 = vmul.f32 1.442695, %v661_v36  ;;  %v978_v48 = vpack.c.bf16 %v896_v7, %v896_v7  ;;  %v1007_v51 = vunpack.c.l.b16 %v975_v27  ;;  %1719 = vrcp.f32 %v779_v16 }
 0x39b   :  { %v781_v46 = vrot.slane %v780_v40, 4  ;;  %v979_v29 = vpack.c.bf16 %v903_v28, %v903_v28  ;;  %v1008_v58 = vunpack.c.l.b16 %v976_v30  ;;  %v1006_v9 = vunpack.c.l.b16 %v974_v38 }
 0x39c   :  { %v1712_v24 = vpop.eup %1711  ;;  %1721 = vpow2.f32 %v690_v41  ;;  %v800_v53 = vadd.f32 %v799_v17, %v798_v13  ;;  %v980_v55 = vpack.c.bf16 %v910_v33, %v910_v33  ;;  %v981_v56 = vpack.c.bf16 %v917_v42, %v917_v42 }
 0x39d   :  { %v782_v54 = vadd.f32 %v781_v46, %v780_v40  ;;  %v1009_v57 = vunpack.c.l.b16 %v977_v22  ;;  %v1010_v59 = vunpack.c.l.b16 %v978_v48  ;;  %v1011_v39 = vunpack.c.l.b16 %v979_v29 }
 0x39e   :  { %v1023_v62 = vsel %vm1022_vm2, %v1007_v51, %v1006_v9  ;;  %1723 = vrcp.f32 %v800_v53  ;;  %v1012_v5 = vunpack.c.l.b16 %v980_v55  ;;  %v1013_v11 = vunpack.c.l.b16 %v981_v56 }
 0x39f   :  { %v783_v47 = vrot.slane %v782_v54, 2  ;;  %v1025_v63 = vsel %vm1024_vm3, %v1008_v58, %v1023_v62  ;;  %v834_v13 = vmul.f32 %v1712_v24, %v1995_v50 }
 0x3a0   :  { %v1027_v0 = vsel %vm1026_vm4, %v1009_v57, %v1025_v63 }
 0x3a1   :  { %v784_v1 = vadd.f32 %v783_v47, %v782_v54  ;;  %v1714_v49 = vpop.eup %1713  ;;  %v1029_v35 = vsel %vm1028_vm5, %v1010_v59, %v1027_v0  ;;  %v856_v16 = vmul.f32 %v1943_v44, %v834_v13 }
 0x3a2   :  { %v1031_v12 = vsel %vm1030_vm6, %v1011_v39, %v1029_v35  ;;  %v833_v45 = vmul.f32 %v1714_v49, %v2009_v4 }
 0x3a3   :  { %v785_v8 = vrot.slane %v784_v1, 1  ;;  %v1716_v34 = vpop.eup %1715  ;;  %v1033_v23 = vsel %vm1032_vm7, %v1012_v5, %v1031_v12  ;;  %v932_v22 = vsel %vm57_vm0, %v856_v16, 0.0 }
 0x3a4   :  { %v2069_v14 = vsel %vm1034_vm8, %v1013_v11, %v1033_v23  ;;  %v832_v19 = vmul.f32 %v1716_v34, %v1997_v52  ;;  %v855_v10 = vmul.f32 %v1943_v44, %v833_v45  ;;  %v933_v29 = vrot.slane %v932_v22, 4 }
 0x3a5   :  { %v2065_v6 = vpop.eup %1717  ;;  %v786_v2 = vadd.f32 %v785_v8, %v784_v1 }
 0x3a6   :  { %v801_v18 = vsel %vm57_vm0, %v2065_v6, 0.0  ;;  %v854_v7 = vmul.f32 %v1943_v44, %v832_v19  ;;  %v925_v28 = vsel %vm57_vm0, %v855_v10, 0.0  ;;  %v934_v57 = vadd.f32 %v933_v29, %v932_v22 }
 0x3a7   :  { %1725 = vrcp.f32 %v786_v2  ;;  %v802_v20 = vrot.slane %v801_v18, 4  ;;  %v1720_v3 = vpop.eup %1719  ;;  %v926_v33 = vrot.slane %v925_v28, 4 }
 0x3a8   :  { %v835_v52 = vmul.f32 %v1720_v3, %v2014_v61  ;;  %v918_v37 = vsel %vm57_vm0, %v854_v7, 0.0  ;;  %v935_v1 = vrot.slane %v934_v57, 2 }
 0x3a9   :  { %v2075_v21 = vpop.eup %1721  ;;  %v803_v25 = vadd.f32 %v802_v20, %v801_v18  ;;  %v919_v48 = vrot.slane %v918_v37, 4  ;;  %v927_v24 = vadd.f32 %v926_v33, %v925_v28 }
 0x3aa   :  { %v787_v4 = vsel %vm57_vm0, %v2075_v21, 0.0  ;;  %v857_v40 = vmul.f32 %v1943_v44, %v835_v52  ;;  %v936_v11 = vadd.f32 %v935_v1, %v934_v57 }
 0x3ab   :  { %v804_v26 = vrot.slane %v803_v25, 2  ;;  %v788_v27 = vrot.slane %v787_v4, 4  ;;  %v1724_v36 = vpop.eup %1723  ;;  %v920_v54 = vadd.f32 %v919_v48, %v918_v37  ;;  %v928_v47 = vrot.slane %v927_v24, 2 }
 0x3ac   :  { %v838_v51 = vmul.f32 %v1724_v36, %v2040_v43  ;;  %v939_v58 = vsel %vm57_vm0, %v857_v40, 0.0  ;;  %v937_v3 = vrot.slane %v936_v11, 1 }
 0x3ad   :  { %v805_v30 = vadd.f32 %v804_v26, %v803_v25  ;;  %v789_v50 = vadd.f32 %v788_v27, %v787_v4  ;;  %v940_v59 = vrot.slane %v939_v58, 4  ;;  %v921_v39 = vrot.slane %v920_v54, 2 }
 0x3ae   :  { %v860_v55 = vmul.f32 %v1943_v44, %v838_v51  ;;  %v929_v49 = vadd.f32 %v928_v47, %v927_v24 }
 0x3af   :  { %v806_v38 = vrot.slane %v805_v30, 1  ;;  %v790_v17 = vrot.slane %v789_v50, 2  ;;  %v941_v0 = vadd.f32 %v940_v59, %v939_v58  ;;  %v922_v35 = vadd.f32 %v921_v39, %v920_v54 }
 0x3b0   :  { %v960_v62 = vsel %vm57_vm0, %v860_v55, 0.0  ;;  %v930_v34 = vrot.slane %v929_v49, 1 }
 0x3b1   :  { %v807_v41 = vadd.f32 %v806_v38, %v805_v30  ;;  %v791_v42 = vadd.f32 %v790_v17, %v789_v50  ;;  %v942_v12 = vrot.slane %v941_v0, 2  ;;  %v923_v18 = vrot.slane %v922_v35, 1 }
 0x3b2   :  { %v931_v10 = vadd.f32 %v930_v34, %v929_v49  ;;  %v938_v50 = vadd.f32 %v937_v3, %v936_v11 }
 0x3b3   :  { %1727 = vrcp.f32 %v807_v41  ;;  %v792_v61 = vrot.slane %v791_v42, 1  ;;  %v943_v13 = vadd.f32 %v942_v12, %v941_v0  ;;  %v924_v27 = vadd.f32 %v923_v18, %v922_v35 }
 0x3b4   :  { %v1726_v46 = vpop.eup %1725  ;;  %v983_v30 = vpack.c.bf16 %v931_v10, %v931_v10 }
 0x3b5   :  { %v836_v9 = vmul.f32 %v1726_v46, %v2055_v60  ;;  %v793_v53 = vadd.f32 %v792_v61, %v791_v42  ;;  %v961_v60 = vrot.slane %v960_v62, 4  ;;  %v944_v28 = vrot.slane %v943_v13, 1 }
 0x3b6   :  { %v982_v17 = vpack.c.bf16 %v924_v27, %v924_v27  ;;  %v1015_v41 = vunpack.c.l.b16 %v983_v30 }
 0x3b7   :  { %v858_v56 = vmul.f32 %v1943_v44, %v836_v9  ;;  %1729 = vrcp.f32 %v793_v53  ;;  %v962_v23 = vadd.f32 %v961_v60, %v960_v62  ;;  %v945_v40 = vadd.f32 %v944_v28, %v943_v13 }
 0x3b8   :  { %v1014_v46 = vunpack.c.l.b16 %v982_v17  ;;  %v1660_v17 = vld [vmem:[%s2219_s2 + $0x44] ss:$16 sps:$4 sm:$0xff]  }
 0x3b9   :  { %v946_v43 = vsel %vm57_vm0, %v858_v56, 0.0  ;;  %v963_v25 = vrot.slane %v962_v23, 2  ;;  %v985_v58 = vpack.c.bf16 %v945_v40, %v945_v40 }
 0x3ba   :  { %v947_v63 = vrot.slane %v946_v43, 4  ;;  %v1036_v9 = vsel %vm1022_vm2, %v1015_v41, %v1014_v46 }
 0x3bb   :  { %v964_v38 = vadd.f32 %v963_v25, %v962_v23 }
 0x3bc   :  { %v948_v5 = vadd.f32 %v947_v63, %v946_v43  ;;  %v1017_v43 = vunpack.c.l.b16 %v985_v58 }
 0x3bd   :  { %v965_v61 = vrot.slane %v964_v38, 1 }
 0x3be   :  { %v949_v45 = vrot.slane %v948_v5, 2 }
 0x3bf   :  { %v966_v54 = vadd.f32 %v965_v61, %v964_v38  ;;  %v1659_v38 = vld [vmem:[%s2219_s2 + $0x64] ss:$16 sps:$4 sm:$0xff]  }
 0x3c0   :  { %v1728_v8 = vpop.eup %1727  ;;  %v950_v4 = vadd.f32 %v949_v45, %v948_v5  ;;  %v1517_v45 = vld [vmem:[%s2220_s3 + $0x3] ss:$0 sm:$0xff] }
 0x3c1   :  { %v839_v2 = vmul.f32 %v1728_v8, %v2065_v6  ;;  %v988_v39 = vpack.c.bf16 %v966_v54, %v966_v54  ;;  %v1518_v54 = vld [vmem:[%s2220_s3 + $0x4] ss:$0 sm:$0xff] }
 0x3c2   :  { %v951_v36 = vrot.slane %v950_v4, 1 }
 0x3c3   :  { %v861_v19 = vmul.f32 %v1943_v44, %v839_v2  ;;  %v1020_v60 = vunpack.c.l.b16 %v988_v39 }
 0x3c4   :  { %v1730_v20 = vpop.eup %1729  ;;  %v952_v51 = vadd.f32 %v951_v36, %v950_v4  ;;  %v1653_v4 = vld [vmem:[%s2219_s2 + $0x24] ss:$16 sps:$4 sm:$0xff]  }
 0x3c5   :  { %v967_v7 = vsel %vm57_vm0, %v861_v19, 0.0  ;;  %v837_v26 = vmul.f32 %v1730_v20, %v2075_v21  ;;  %v984_v21 = vpack.c.bf16 %v938_v50, %v938_v50 }
 0x3c6   :  { %v968_v16 = vrot.slane %v967_v7, 4  ;;  %v986_v55 = vpack.c.bf16 %v952_v51, %v952_v51 }
 0x3c7   :  { %v859_v52 = vmul.f32 %v1943_v44, %v837_v26  ;;  %v1016_v53 = vunpack.c.l.b16 %v984_v21 }
 0x3c8   :  { %v969_v6 = vadd.f32 %v968_v16, %v967_v7  ;;  %v1018_v62 = vunpack.c.l.b16 %v986_v55 }
 0x3c9   :  { %v953_v37 = vsel %vm57_vm0, %v859_v52, 0.0  ;;  %v1037_v59 = vsel %vm1024_vm3, %v1016_v53, %v1036_v9 }
 0x3ca   :  { %v954_v33 = vrot.slane %v953_v37, 4  ;;  %v970_v22 = vrot.slane %v969_v6, 2  ;;  %v1038_v0 = vsel %vm1026_vm4, %v1017_v43, %v1037_v59  ;;  %v1519_v59 = vld [vmem:[%s2220_s3 + $0x5] ss:$0 sm:$0xff] }
 0x3cb   :  { %v1039_v5 = vsel %vm1028_vm5, %v1018_v62, %v1038_v0 }
 0x3cc   :  { %v955_v42 = vadd.f32 %v954_v33, %v953_v37  ;;  %v971_v48 = vadd.f32 %v970_v22, %v969_v6  ;;  %v1657_v37 = vld [vmem:[%s2219_s2 + $0x20] ss:$16 sps:$4 sm:$0xff]   ;;  %v2147_v33 = vld [vmem:[%s2219_s2 + $0x24] ss:$16 sps:$4 sm:$0xff]  }
 0x3cd   :  { %v2154_v22 = vld [vmem:[%s2219_s2 + $0x4] ss:$16 sps:$4 sm:$0xff]  }
 0x3ce   :  { %v956_v44 = vrot.slane %v955_v42, 2  ;;  %v972_v29 = vrot.slane %v971_v48, 1 }
 0x3d0   :  { %v957_v24 = vadd.f32 %v956_v44, %v955_v42  ;;  %v973_v57 = vadd.f32 %v972_v29, %v971_v48 }
 0x3d2   :  { %v958_v56 = vrot.slane %v957_v24, 1  ;;  %v989_v1 = vpack.c.bf16 %v973_v57, %v973_v57 }
 0x3d4   :  { %v959_v47 = vadd.f32 %v958_v56, %v957_v24  ;;  %v1021_v35 = vunpack.c.l.b16 %v989_v1 }
 0x3d6   :  { %v987_v63 = vpack.c.bf16 %v959_v47, %v959_v47 }
 0x3d8   :  { %v1019_v49 = vunpack.c.l.b16 %v987_v63 }
 0x3da   :  { %v1040_v8 = vsel %vm1030_vm6, %v1019_v49, %v1039_v5 }
 0x3db   :  { %v1041_v11 = vsel %vm1032_vm7, %v1020_v60, %v1040_v8  ;;  %v1520_v60 = vld [vmem:[%s2220_s3 + $0x6] ss:$0 sm:$0xff] }
 0x3dc   :  { %v1042_v12 = vsel %vm1034_vm8, %v1021_v35, %v1041_v11 }
 0x3dd   :  { %v1043_v34 = vpack.c.b16 %v1042_v12, %v2069_v14 }
 0x3df   :  { %1601 = vmatmul.mubr.msk.bf16.vlgmr.msra.gmra.mxu0 %vm57_vm0, %v1043_v34 }
 0x3e0   :  { %1608 = vmatprep.mubr.msk.bf16.mxu0 %vm1770_vm1, %v1769_v15 }
 0x49f   :  { %v1097_v23 = vpop.f32.mrf.mxu0 }
 0x4a0   :  { %v1104_v2 = vadd.f32 %v1097_v23, %v1828_v31  ;;  %v1655_v31 = vld [vmem:[%s2219_s2] ss:$16 sps:$4 sm:$0xff]  }
 0x4a1   :  { %v1602_v18 = vpop.f32.mrf.mxu0 }
 0x4a2   :  { %v1110_v19 = vadd.f32 %v1517_v45, %v1104_v2 }
 0x4a3   :  { %v1100_v20 = vpop.f32.mrf.mxu0 }
 0x4a4   :  { %v1105_v3 = vadd.f32 %v1100_v20, %v1830_v32  ;;  %v1112_v13 = vsel %vm57_vm0, %v1110_v19, 0.0  ;;  %v1658_v32 = vld [vmem:[%s2219_s2 + $0x4] ss:$16 sps:$4 sm:$0xff]  }
 0x4a5   :  { %1113 = vadd.xlane.f32.xlu0 %v1112_v13  ;;  %v1603_v14 = vpop.f32.mrf.mxu0 }
 0x4a6   :  { %v1111_v10 = vadd.f32 %v1517_v45, %v1105_v3 }
 0x4a8   :  { %v1115_v25 = vsel %vm57_vm0, %v1111_v10, 0.0 }
 0x4a9   :  { %1116 = vadd.xlane.f32.xlu1 %v1115_v25 }
 0x4ba   :  { %1177 = vrot.lane.b32.xlu1 %v1653_v4, %s1774_s17 }
 0x4be   :  { %1171 = vrot.lane.b32.xlu1 %v1655_v31, %s1774_s17 }
 0x4c2   :  { %1173 = vrot.lane.b32.xlu1 %v1658_v32, %s1774_s17 }
 0x4c6   :  { %1261 = vrot.lane.b32.xlu1 %v1660_v17, %s1773_s9 }
 0x4ca   :  { %1257 = vrot.lane.b32.xlu1 %v2154_v22, %s1773_s9 }
 0x52e   :  { %v1114_v7 = vpop.xlane.xlu0 %1113 }
 0x52f   :  { %v1118_v26 = vmul.f32 0.03125, %v1114_v7 }
 0x531   :  { %v1120_v27 = vsub.f32 %v1110_v19, %v1118_v26 }
 0x532   :  { %v1117_v16 = vpop.xlane.xlu1 %1116 }
 0x533   :  { %v1119_v52 = vmul.f32 0.03125, %v1117_v16  ;;  %v1122_v28 = vmul.f32 %v1120_v27, %v1120_v27 }
 0x535   :  { %v1121_v30 = vsub.f32 %v1111_v10, %v1119_v52  ;;  %v1124_v6 = vsel %vm57_vm0, %v1122_v28, 0.0 }
 0x536   :  { %1125 = vadd.xlane.f32.xlu0 %v1124_v6  ;;  %v1178_v40 = vpop.permute.xlu1 %1177 }
 0x537   :  { %v1123_v50 = vmul.f32 %v1121_v30, %v1121_v30 }
 0x539   :  { %v1127_v36 = vsel %vm57_vm0, %v1123_v50, 0.0 }
 0x53a   :  { %1128 = vadd.xlane.f32.xlu0 %v1127_v36  ;;  %v1172_v48 = vpop.permute.xlu1 %1171 }
 0x53e   :  { %v1174_v29 = vpop.permute.xlu1 %1173 }
 0x53f   :  { %v1180_v58 = vsel %vm57_vm0, %v1172_v48, %v1174_v29 }
 0x542   :  { %v1262_v1 = vpop.permute.xlu1 %1261 }
 0x546   :  { %v1258_v49 = vpop.permute.xlu1 %1257 }
 0x550   :  { %1175 = vrot.lane.b32.xlu0 %v1657_v37, %s1774_s17 }
 0x554   :  { %1263 = vrot.lane.b32.xlu0 %v1659_v38, %s1773_s9 }
 0x558   :  { %1259 = vrot.lane.b32.xlu0 %v2147_v33, %s1773_s9 }
 0x5bf   :  { %v1126_v41 = vpop.xlane.xlu0 %1125 }
 0x5c0   :  { %v1130_v42 = vmul.f32 0.03125, %v1126_v41 }
 0x5c2   :  { %v1132_v21 = vadd.f32 1e-12, %v1130_v42 }
 0x5c3   :  { %v1129_v51 = vpop.xlane.xlu0 %1128 }
 0x5c4   :  { %1731 = vrsqrt.f32 %v1132_v21  ;;  %v1131_v61 = vmul.f32 0.03125, %v1129_v51 }
 0x5c6   :  { %v1133_v46 = vadd.f32 1e-12, %v1131_v61 }
 0x5c7   :  { %v1176_v44 = vpop.permute.xlu0 %1175 }
 0x5c8   :  { %1733 = vrsqrt.f32 %v1133_v46  ;;  %v1181_v24 = vsel %vm57_vm0, %v1176_v44, %v1178_v40 }
 0x5c9   :  { %1605 = vmatpush3.bf16.msra.mxu0 %v1181_v24 }
 0x5ca   :  { %1606 = vmatprep.subr.bf16.mxu0 %v1769_v15 }
 0x5cb   :  { %v1264_v63 = vpop.permute.xlu0 %1263 }
 0x5cd   :  { %1607 = vmatpush3.bf16.msra.mxu0 %v1180_v58 }
 0x5ce   :  { %1612 = vmatprep.subr.bf16.mxu0 %v1769_v15 }
 0x5cf   :  { %v1260_v0 = vpop.permute.xlu0 %1259 }
 0x5d1   :  { %v1732_v9 = vpop.eup %1731 }
 0x5d2   :  { %v1136_v53 = vmul.f32 %v1732_v9, %v1120_v27 }
 0x5d4   :  { %v1142_v57 = vmul.f32 %v1518_v54, %v1136_v53 }
 0x5d5   :  { %v1734_v55 = vpop.eup %1733 }
 0x5d6   :  { %v1137_v56 = vmul.f32 %v1734_v55, %v1121_v30  ;;  %v1148_v43 = vadd.f32 %v1519_v59, %v1142_v57  ;;  %v1529_v30 = vld [vmem:[%s2220_s3 + $0x7] ss:$0 sm:$0xff] }
 0x5d8   :  { %v1143_v47 = vmul.f32 %v1518_v54, %v1137_v56 }
 0x5da   :  { %v1149_v39 = vadd.f32 %v1519_v59, %v1143_v47 }
 0x5dc   :  { %v1150_v62 = vpack.c.bf16 %v1149_v39, %v1148_v43 }
 0x5de   :  { %1609 = vmatmul.mubr.msk.bf16.vlgmr.msra.gmra.mxu0 %vm57_vm0, %v1150_v62  ;;  %v1531_v62 = vld [vmem:[%s2220_s3 + $0x9] ss:$0 sm:$0xff] }
 0x5df   :  { %1620 = vmatprep.mubr.msk.bf16.mxu0 %vm1770_vm1, %v1769_v15  ;;  %1613 = vmatpush3.bf16.msra.mxu0 %v1264_v63 }
 0x5e0   :  { %1614 = vmatprep.subr.bf16.mxu0 %v1769_v15 }
 0x5e3   :  { %1615 = vmatpush3.bf16.msra.mxu0 %v1262_v1 }
 0x5e4   :  { %1616 = vmatprep.subr.bf16.mxu0 %v1769_v15 }
 0x5e7   :  { %1617 = vmatpush3.bf16.msra.mxu0 %v1260_v0 }
 0x5e8   :  { %1618 = vmatprep.subr.bf16.mxu0 %v1769_v15 }
 0x5eb   :  { %1619 = vmatpush3.bf16.msra.mxu0 %v1258_v49 }
 0x5ec   :  { %1632 = vmatprep.subr.bf16.mxu0 %v1769_v15 }
 0x69e   :  { %v1221_v5 = vpop.f32.mrf.mxu0 }
 0x69f   :  { %v1222_v35 = vadd.f32 %v1520_v60, %v1221_v5 }
 0x6a0   :  { %v1610_v8 = vpop.f32.mrf.mxu0 }
 0x6a1   :  { %v1228_v11 = vmul.f32 %v1222_v35, %v1222_v35 }
 0x6a2   :  { %v1224_v12 = vpop.f32.mrf.mxu0 }
 0x6a3   :  { %v1230_v34 = vmul.f32 %v1228_v11, %v1222_v35  ;;  %v1225_v23 = vadd.f32 %v1520_v60, %v1224_v12 }
 0x6a4   :  { %v1611_v45 = vpop.f32.mrf.mxu0 }
 0x6a5   :  { %v1232_v2 = vmul.f32 0.044715, %v1230_v34  ;;  %v1229_v18 = vmul.f32 %v1225_v23, %v1225_v23 }
 0x6a7   :  { %v1234_v19 = vadd.f32 %v1232_v2, %v1222_v35  ;;  %v1231_v20 = vmul.f32 %v1229_v18, %v1225_v23  ;;  %v1661_v2 = vld [vmem:[%s2219_s2 + $0x28] ss:$16 sps:$4 sm:$0xff]  }
 0x6a8   :  { %v1662_v18 = vld [vmem:[%s2219_s2 + $0x8] ss:$16 sps:$4 sm:$0xff]   ;;  %s1775_s2 = smov [#allocation2]  }
 0x6a9   :  { %v1236_v3 = vmul.f32 0.7978846, %v1234_v19  ;;  %v1233_v13 = vmul.f32 0.044715, %v1231_v20  ;;  %v1532_v19 = vld [vmem:[%s2220_s3 + $0xa] ss:$0 sm:$0xff] }
 0x6aa   :  { %s1490_s23 = sshll.u32 %s1775_s2, 4  ;;  %s1491_s23 = int_to_ptr.vmem [resolvable:$true] %s1490_s23 }
 0x6ab   :  { %1735 = vtanh.f32 %v1236_v3  ;;  %v1235_v14 = vadd.f32 %v1233_v13, %v1225_v23  ;;  %s1747_s24 = scalar_lea.vmem %s1491_s23, 32  ;;  %p1752_p1 = scmp.lt.s32.totalorder %s1491_s23, %s1491_s23 }
 0x6ac   :  { %p1748_p0 = scmp.ne.s32.totalorder %s1491_s23, %s1747_s24  ;;  %p1753_p2 = scmp.lt.s32.totalorder %s1747_s24, %s1747_s24 }
 0x6ad   :  { %v1237_v10 = vmul.f32 0.7978846, %v1235_v14 }
 0x6ae   :  { %p1754_p3 = por %p1753_p2, %p1752_p1 }
 0x6af   :  { %1737 = vtanh.f32 %v1237_v10 }
 0x6b0   :  { %p1755_p4 = pnand %p1754_p3, %p1748_p0 }
 0x6b8   :  { %v1736_v25 = vpop.eup %1735 }
 0x6b9   :  { %v1240_v4 = vadd.f32 1.0, %v1736_v25 }
 0x6bb   :  { %v1242_v32 = vmul.f32 0.5, %v1240_v4 }
 0x6bc   :  { %v1738_v31 = vpop.eup %1737 }
 0x6bd   :  { %v1241_v7 = vadd.f32 1.0, %v1738_v31  ;;  %v1244_v27 = vmul.f32 %v1242_v32, %v1222_v35 }
 0x6bf   :  { %v1243_v26 = vmul.f32 0.5, %v1241_v7 }
 0x6c1   :  { %v1245_v16 = vmul.f32 %v1243_v26, %v1225_v23 }
 0x6c3   :  { %v1246_v52 = vpack.c.bf16 %v1245_v16, %v1244_v27 }
 0x6c5   :  { %1621 = vmatmul.mubr.msk.bf16.vlgmr.msra.gmra.mxu0 %vm1269_vm9, %v1246_v52 }
 0x6c6   :  { %1636 = vmatprep.mubr.msk.bf16.mxu0 %vm1770_vm1, %v1769_v15  ;;  %1633 = vmatpush3.bf16.msra.mxu0 %v1661_v2 }
 0x6c7   :  { %1634 = vmatprep.subr.bf16.mxu0 %v1769_v15 }
 0x6ca   :  { %1635 = vmatpush3.bf16.msra.mxu0 %v1662_v18 }
 0x785   :  { %v1307_v28 = vpop.f32.mrf.mxu0 }
 0x786   :  { %v1314_v6 = vadd.f32 %v1307_v28, %v1148_v43 }
 0x787   :  { %v1622_v50 = vpop.f32.mrf.mxu0 }
 0x788   :  { %v1320_v36 = vadd.f32 %v1529_v30, %v1314_v6 }
 0x789   :  { %v1310_v37 = vpop.f32.mrf.mxu0 }
 0x78a   :  { %v1315_v38 = vadd.f32 %v1310_v37, %v1149_v39  ;;  %v1322_v17 = vsel %vm57_vm0, %v1320_v36, 0.0  ;;  %v1530_v39 = vld [vmem:[%s2220_s3 + $0x8] ss:$0 sm:$0xff] }
 0x78b   :  { %1323 = vadd.xlane.f32.xlu1 %v1322_v17  ;;  %v1623_v40 = vpop.f32.mrf.mxu0 }
 0x78c   :  { %v1321_v41 = vadd.f32 %v1529_v30, %v1315_v38 }
 0x78e   :  { %v1325_v42 = vsel %vm57_vm0, %v1321_v41, 0.0 }
 0x78f   :  { %1326 = vadd.xlane.f32.xlu0 %v1325_v42 }
 0x79c   :  { %1373 = vrot.lane.b32.xlu1 %v2154_v22, %s1774_s17 }
 0x814   :  { %v1324_v48 = vpop.xlane.xlu1 %1323 }
 0x815   :  { %v1328_v21 = vmul.f32 0.03125, %v1324_v48 }
 0x817   :  { %v1330_v46 = vsub.f32 %v1320_v36, %v1328_v21 }
 0x818   :  { %v1327_v51 = vpop.xlane.xlu0 %1326  ;;  %v1374_v47 = vpop.permute.xlu1 %1373 }
 0x819   :  { %v1329_v61 = vmul.f32 0.03125, %v1327_v51  ;;  %v1332_v58 = vmul.f32 %v1330_v46, %v1330_v46 }
 0x81b   :  { %v1331_v44 = vsub.f32 %v1321_v41, %v1329_v61  ;;  %v1334_v9 = vsel %vm57_vm0, %v1332_v58, 0.0 }
 0x81d   :  { %v1333_v29 = vmul.f32 %v1331_v44, %v1331_v44 }
 0x81f   :  { %v1337_v24 = vsel %vm57_vm0, %v1333_v29, 0.0 }
 0x820   :  { %1338 = vadd.xlane.f32.xlu0 %v1337_v24 }
 0x824   :  { %1335 = vadd.xlane.f32.xlu0 %v1334_v9 }
 0x83a   :  { %1375 = vrot.lane.b32.xlu0 %v2147_v33, %s1774_s17 }
 0x8a9   :  { %v1339_v53 = vpop.xlane.xlu0 %1338 }
 0x8aa   :  { %v1341_v54 = vmul.f32 0.03125, %v1339_v53 }
 0x8ac   :  { %v1343_v22 = vadd.f32 1e-12, %v1341_v54 }
 0x8ad   :  { %v1336_v55 = vpop.xlane.xlu0 %1335 }
 0x8ae   :  { %1739 = vrsqrt.f32 %v1343_v22  ;;  %v1340_v56 = vmul.f32 0.03125, %v1336_v55 }
 0x8b0   :  { %v1342_v57 = vadd.f32 1e-12, %v1340_v56 }
 0x8b1   :  { %v1376_v59 = vpop.permute.xlu0 %1375 }
 0x8b2   :  { %1741 = vrsqrt.f32 %v1342_v57  ;;  %1625 = vmatpush3.bf16.msra.mxu1 %v1376_v59 }
 0x8b3   :  { %1626 = vmatprep.subr.bf16.mxu1 %v1769_v15  ;;  %v1534_v15 = vld [vmem:[%s2220_s3 + $0xb] ss:$0 sm:$0xff] }
 0x8b6   :  { %1627 = vmatpush3.bf16.msra.mxu1 %v1374_v47 }
 0x8bb   :  { %v1740_v43 = vpop.eup %1739 }
 0x8bc   :  { %v1347_v33 = vmul.f32 %v1740_v43, %v1331_v44 }
 0x8be   :  { %v1353_v63 = vmul.f32 %v1530_v39, %v1347_v33 }
 0x8bf   :  { %v1742_v1 = vpop.eup %1741 }
 0x8c0   :  { %v1359_v0 = vadd.f32 %v1531_v62, %v1353_v63  ;;  %v1346_v49 = vmul.f32 %v1742_v1, %v1330_v46 }
 0x8c2   :  { %v1361_v60 = vpack.c.bf16 %v1359_v0, %v1359_v0  ;;  %v1352_v5 = vmul.f32 %v1530_v39, %v1346_v49 }
 0x8c4   :  { %v1369_v35 = vunpack.c.l.b16 %v1361_v60  ;;  %v1358_v8 = vadd.f32 %v1531_v62, %v1352_v5 }
 0x8c6   :  { %v1360_v11 = vpack.c.bf16 %v1358_v8, %v1358_v8  ;;  %v1370_v12 = vrot.slane %v1369_v35, 7 }
 0x8c8   :  { %v1368_v34 = vunpack.c.l.b16 %v1360_v11 }
 0x8ca   :  { %v1371_v23 = vsel %vm1022_vm2, %v1370_v12, %v1368_v34 }
 0x8cb   :  { %v1372_v45 = vpack.c.b16 %v1371_v23, %v1371_v23 }
 0x8cd   :  { %1629 = vmatmul.mubr.msk.bf16.vlgmr.msra.gmra.mxu1 %vm57_vm0, %v1372_v45 }
 0x98d   :  { %v1416_v20 = vpop.f32.mrf.mxu1 }
 0x98e   :  { %v1417_v3 = vadd.f32 %v1532_v19, %v1416_v20 }
 0x98f   :  { %v1630_v13 = vpop.f32.mrf.mxu1 }
 0x990   :  { %1743 = vtanh.f32 %v1417_v3 }
 0x991   :  { %v1419_v14 = vpop.f32.mrf.mxu1 }
 0x993   :  { %v1631_v10 = vpop.f32.mrf.mxu1 }
 0x99d   :  { %v1744_v25 = vpop.eup %1743 }
 0x99e   :  { %v1423_v4 = vpack.c.bf16 %v1744_v25, %v1744_v25 }
 0x9a0   :  { %1637 = vmatmul.mubr.msk.bf16.vlgmr.msra.gmra.mxu0 %vm57_vm0, %v1423_v4 }
 0xa60   :  { %v1477_v31 = vpop.f32.mrf.mxu0 }
 0xa61   :  { %v1478_v32 = vadd.f32 %v1534_v15, %v1477_v31 }
 0xa62   :  { %v1638_v7 = vpop.f32.mrf.mxu0 }
 0xa63   :  { %1483 = vst [vmem:[#allocation2] sm:$0x3] %v1478_v32 }
 0xa64   :  { %v1480_v26 = vpop.f32.mrf.mxu0 }
 0xa65   :  { %1758 = shalt.err (!%p1755_p4)
}
 0xa66   :  { %1493 = dma.vmem_to_hbm [thread:$0]  %s1491_s23, 32, %s2221_s4, [#allocation3]   ;;  %v1639_v27 = vpop.f32.mrf.mxu0 }
 0xa67   :  { %1767 = dma.done.wait [#allocation3], 32  }
 0xa68   :  { %1768 = vsyncadd [#allocation3], 4294967264 }
 0xa69   :  { %1497 = vsyncpa [#allocation3], 1 }

</bundles_post_ra>
